<compile_context>
chip_gen: v7x
topology: tpu7x:2x2x1
jax: 0.10.0
libtpu: 0.0.40
codegen_flags: <defaults>
</compile_context>

<pallas_src>
import functools
import math

import jax
import jax.numpy as jnp
from jax.experimental import pallas as pl
from jax.experimental.pallas import tpu as pltpu

_SUBLANES = 8  # f32 sublane granularity


# ----------------------------------------------------------------------------
# In-kernel helpers (traced inside the Pallas kernels)
# ----------------------------------------------------------------------------
def _fill_pad_slab(pad_ref, x_ref, bl, *, H, W, Wp, ph, pw, L, c_in, c_in_pad):
    """Build the zero-padded, W-major (stride Wp) image slab for batch elem bl."""
    dt = pad_ref.dtype
    # Channel-padding rows only ever meet zero weights, but must hold real zeros
    # so garbage VMEM can't inject NaN/Inf.  Re-zeroed every grid step so the
    # kernel stays correct when the batch grid axis is split across TensorCores.
    if c_in_pad > c_in:
        pad_ref[bl, c_in:, :] = jnp.zeros((c_in_pad - c_in, L), dt)
    # Halo-only zeroing: the interior is fully overwritten by the row copies.
    prefix = ph * Wp + pw                      # top pad rows + left pad of data row 0
    data_end = (H - 1 + ph) * Wp + pw + W      # end of the last data row
    if prefix > 0:
        pad_ref[bl, :c_in, :prefix] = jnp.zeros((c_in, prefix), dt)
    if L > data_end:                           # right pad of last row + bottom + tail
        pad_ref[bl, :c_in, data_end:] = jnp.zeros((c_in, L - data_end), dt)
    if pw > 0:
        gap_zeros = jnp.zeros((c_in, 2 * pw), dt)   # hoisted (no per-iter broadcast)
        for h in range(H - 1):                 # right pad of row h + left pad of row h+1
            g0 = (h + ph) * Wp + pw + W
            pad_ref[bl, :c_in, g0:g0 + 2 * pw] = gap_zeros
    # Interior: W-major row copies from the lane-dense (C_in, H*W) input block.
    x2 = x_ref[bl]
    for h in range(H):
        base = (h + ph) * Wp + pw
        pad_ref[bl, :c_in, base:base + W] = x2[:, h * W:(h + 1) * W]


def _store_rows(o_ref, bl, acc, *, Ho, Wo, Wp):
    """Drop the (Wp - Wo) junk columns of the stride-Wp matmul result in-kernel."""
    if Wo == Wp:
        o_ref[bl] = acc.astype(o_ref.dtype)
    else:
        for h in range(Ho):
            o_ref[bl, :, h * Wo:(h + 1) * Wo] = \
                acc[:, h * Wp:h * Wp + Wo].astype(o_ref.dtype)


# ----------------------------------------------------------------------------
# Kernels
# ----------------------------------------------------------------------------
def _conv_1x1_kernel(x_ref, w_ref, b_ref, o_ref, *, bt):
    """1x1 conv fast path: (C_out, C_in) @ (C_in, H*W) + bias per batch element."""
    w = w_ref[...]
    bias = b_ref[...]
    for bl in range(bt):
        acc = jnp.dot(w, x_ref[bl], preferred_element_type=jnp.float32)
        o_ref[bl] = (acc + bias).astype(o_ref.dtype)


def _conv_kxk_im2col_kernel(x_ref, w_ref, b_ref, o_ref, pad_ref, col_ref, *,
                            H, W, Wp, Ho, Wo, ph, pw, L, N, c_in, c_in_pad,
                            bt, tap_offsets):
    """KxK conv via a single fused im2col MXU matmul (tiny-C_in path)."""
    for bl in range(bt):
        _fill_pad_slab(pad_ref, x_ref, bl, H=H, W=W, Wp=Wp, ph=ph, pw=pw, L=L,
                       c_in=c_in, c_in_pad=c_in_pad)
    # im2col: KH*KW statically shifted slices, 8-sublane-aligned row groups,
    # batch folded onto the lane axis.
    for idx, s in enumerate(tap_offsets):
        r0 = idx * c_in_pad
        for bl in range(bt):
            col_ref[r0:r0 + c_in_pad, bl * N:(bl + 1) * N] = pad_ref[bl, :, s:s + N]
    # One lane-dense MXU matmul for all bt elements; f32 accumulation.
    acc = jnp.dot(w_ref[...], col_ref[...], preferred_element_type=jnp.float32)
    acc = acc + b_ref[...]
    for bl in range(bt):
        _store_rows(o_ref, bl, acc[:, bl * N:(bl + 1) * N], Ho=Ho, Wo=Wo, Wp=Wp)


def _conv_kxk_tapsum_kernel(x_ref, w_ref, b_ref, o_ref, pad_ref, *,
                            H, W, Wp, Ho, Wo, ph, pw, L, N, c_in, c_in_pad,
                            bt, tap_offsets):
    """KxK conv via per-tap accumulation (no im2col expansion; large-C_in path)."""
    w_all = w_ref[...]
    bias = b_ref[...]
    c_out = w_all.shape[0]
    for bl in range(bt):
        _fill_pad_slab(pad_ref, x_ref, bl, H=H, W=W, Wp=Wp, ph=ph, pw=pw, L=L,
                       c_in=c_in, c_in_pad=c_in_pad)
        acc = jnp.zeros((c_out, N), jnp.float32)
        for idx, s in enumerate(tap_offsets):
            w_tap = w_all[:, idx * c_in_pad:(idx + 1) * c_in_pad]
            acc = acc + jnp.dot(w_tap, pad_ref[bl, :, s:s + N],
                                preferred_element_type=jnp.float32)
        acc = acc + bias
        _store_rows(o_ref, bl, acc, Ho=Ho, Wo=Wo, Wp=Wp)


# ----------------------------------------------------------------------------
# Wrapper (ConvNorm2d.forward equivalent)
# ----------------------------------------------------------------------------
def conv_norm_2d(x, weight, bias=None, *, stride=1, padding=None, dilation=1,
                 compute_dtype=jnp.float32, max_batch_tile=8,
                 force_tap_accum=None, interpret=False):
    """ConvNorm2d forward: Conv2d(NCHW) with the module's default padding rule.

    x:      (B, C_in, H, W)
    weight: (C_out, C_in, KH, KW)
    bias:   (C_out,) or None
    """
    B, C_in, H, W = x.shape
    C_out, c_in_w, KH, KW = weight.shape
    assert c_in_w == C_in

    dh, dw = (dilation, dilation) if isinstance(dilation, int) else tuple(dilation)
    if padding is None:
        # ConvNorm2d default: padding = dilation * (k - 1) / 2  (k must be odd)
        assert KH % 2 == 1 and KW % 2 == 1
        ph = dh * (KH - 1) // 2
        pw = dw * (KW - 1) // 2
    elif isinstance(padding, int):
        ph = pw = padding
    else:
        ph, pw = padding
    st = (stride, stride) if isinstance(stride, int) else tuple(stride)
    assert st == (1, 1), "TODO(synk): stride != 1 not implemented"

    Hp, Wp = H + 2 * ph, W + 2 * pw
    Ho = Hp - dh * (KH - 1)                 # output height (stride 1)
    Wo = Wp - dw * (KW - 1)                 # output width  (stride 1)
    assert Ho > 0 and Wo > 0

    # Batch tile: amortize per-grid-step overhead over several batch elements.
    bt = 1
    for d in range(1, min(B, max_batch_tile) + 1):
        if B % d == 0:
            bt = d
    grid = (B // bt,)

    x2 = x.reshape(B, C_in, H * W).astype(compute_dtype)        # lane-dense input
    b2 = (bias if bias is not None else jnp.zeros((C_out,), jnp.float32)
          ).astype(jnp.float32).reshape(C_out, 1)

    n_out = Ho * Wo
    out_shape = jax.ShapeDtypeStruct((B, C_out, n_out), jnp.float32)
    x_spec = pl.BlockSpec((bt, C_in, H * W), lambda g: (g, 0, 0))
    b_spec = pl.BlockSpec((C_out, 1), lambda g: (0, 0))
    out_spec = pl.BlockSpec((bt, C_out, n_out), lambda g: (g, 0, 0))
    cparams = pltpu.CompilerParams(dimension_semantics=("parallel",))

    if KH == 1 and KW == 1 and ph == 0 and pw == 0:
        # --- 1x1 fast path (module default kernel_size) ----------------------
        w2 = weight.reshape(C_out, C_in).astype(compute_dtype)
        out = pl.pallas_call(
            functools.partial(_conv_1x1_kernel, bt=bt),
            out_shape=out_shape, grid=grid,
            in_specs=[x_spec, pl.BlockSpec((C_out, C_in), lambda g: (0, 0)), b_spec],
            out_specs=out_spec,
            compiler_params=cparams, interpret=interpret,
        )(x2, w2, b2)
        return out.reshape(B, C_out, Ho, Wo)

    # --- general KxK path -----------------------------------------------------
    c_in_pad = -(-C_in // _SUBLANES) * _SUBLANES     # sublane-aligned tap groups
    KC = KH * KW * c_in_pad
    N = Ho * Wp                                      # W-major slab width (stride Wp)
    L = Hp * Wp + dw * (KW - 1)                      # exact bound for every tap slice
    tap_offsets = tuple(kh * dh * Wp + kw * dw
                        for kh in range(KH) for kw in range(KW))

    # Pack weights: w2[co, (kh*KW + kw)*c_in_pad + ci]; padded channels get 0.
    wt = jnp.transpose(weight, (0, 2, 3, 1))                      # (C_out,KH,KW,C_in)
    wt = jnp.pad(wt, ((0, 0), (0, 0), (0, 0), (0, c_in_pad - C_in)))
    w2 = wt.reshape(C_out, KC).astype(compute_dtype)

    # Fused im2col matmul only while the KH*KW x activation expansion is cheap
    # (tiny C_in); otherwise accumulate per tap and skip the col scratch.
    tap_accum = (c_in_pad >= 64) if force_tap_accum is None else bool(force_tap_accum)

    static = dict(H=H, W=W, Wp=Wp, Ho=Ho, Wo=Wo, ph=ph, pw=pw, L=L, N=N,
                  c_in=C_in, c_in_pad=c_in_pad, bt=bt, tap_offsets=tap_offsets)
    if tap_accum:
        kernel = functools.partial(_conv_kxk_tapsum_kernel, **static)
        scratch = [pltpu.VMEM((bt, c_in_pad, L), compute_dtype)]
    else:
        kernel = functools.partial(_conv_kxk_im2col_kernel, **static)
        scratch = [pltpu.VMEM((bt, c_in_pad, L), compute_dtype),   # padded slab
                   pltpu.VMEM((KC, bt * N), compute_dtype)]        # im2col matrix

    out = pl.pallas_call(
        kernel, out_shape=out_shape, grid=grid,
        in_specs=[x_spec, pl.BlockSpec((C_out, KC), lambda g: (0, 0)), b_spec],
        out_specs=out_spec,
        scratch_shapes=scratch,
        compiler_params=cparams, interpret=interpret,
    )(x2, w2, b2)
    # Contiguous reshape only (free) — no post-kernel junk-column slice pass.
    return out.reshape(B, C_out, Ho, Wo)


# ----------------------------------------------------------------------------
# Pure-JAX reference (correctness check only)
# ----------------------------------------------------------------------------
def _conv2d_reference(x, w, b, ph, pw, dh, dw):
    out = jax.lax.conv_general_dilated(
        x, w, window_strides=(1, 1), padding=((ph, ph), (pw, pw)),
        rhs_dilation=(dh, dw),
        dimension_numbers=("NCHW", "OIHW", "NCHW"),
        precision=jax.lax.Precision.HIGHEST)
    if b is not None:
        out = out + b[None, :, None, None]
    return out


def _xavier_uniform(key, shape, gain=1.0):
    # torch.nn.init.xavier_uniform_ for Conv2d weight (O, I, KH, KW).
    c_out, c_in, kh, kw = shape
    fan_in, fan_out = c_in * kh * kw, c_out * kh * kw
    bound = gain * math.sqrt(6.0 / (fan_in + fan_out))
    return jax.random.uniform(key, shape, jnp.float32, -bound, bound)


# ----------------------------------------------------------------------------
if __name__ == "__main__":
    key = jax.random.PRNGKey(0)
    kx, kw3, kb3, kw1, kb1 = jax.random.split(key, 5)

    B, C_in, H, W = 2, 4, 16, 16
    C_out = 8
    x = jax.random.normal(kx, (B, C_in, H, W), jnp.float32)

    # --- config 1: ConvNorm2d(4, 8, kernel_size=3)  (padding auto = 1) -------
    K = 3
    w3 = _xavier_uniform(kw3, (C_out, C_in, K, K))            # gain('linear') = 1.0
    b_bound = 1.0 / math.sqrt(C_in * K * K)                   # PyTorch Conv2d bias init
    b3 = jax.random.uniform(kb3, (C_out,), jnp.float32, -b_bound, b_bound)

    ref3 = _conv2d_reference(x, w3, b3, 1, 1, 1, 1)

    conv3 = jax.jit(lambda a, w, b: conv_norm_2d(a, w, b))            # im2col path
    out3 = jax.block_until_ready(conv3(x, w3, b3))
    assert out3.shape == (B, C_out, H, W), out3.shape
    assert bool(jnp.all(jnp.isfinite(out3)))
    assert bool(jnp.allclose(out3, ref3, atol=1e-2, rtol=1e-2)), \
        float(jnp.max(jnp.abs(out3 - ref3)))

    # same config through the per-tap accumulation kernel (large-C_in path)
    conv3t = jax.jit(lambda a, w, b: conv_norm_2d(a, w, b, force_tap_accum=True))
    out3t = jax.block_until_ready(conv3t(x, w3, b3))
    assert bool(jnp.allclose(out3t, ref3, atol=1e-2, rtol=1e-2)), \
        float(jnp.max(jnp.abs(out3t - ref3)))

    # --- config 2: ConvNorm2d(4, 8) default kernel_size=1 (1x1 fast path) ----
    w1 = _xavier_uniform(kw1, (C_out, C_in, 1, 1))
    b1 = jax.random.uniform(kb1, (C_out,), jnp.float32,
                            -1.0 / math.sqrt(C_in), 1.0 / math.sqrt(C_in))
    conv1 = jax.jit(lambda a, w, b: conv_norm_2d(a, w, b))
    out1 = jax.block_until_ready(conv1(x, w1, b1))
    assert out1.shape == (B, C_out, H, W), out1.shape
    ref1 = _conv2d_reference(x, w1, b1, 0, 0, 1, 1)
    assert bool(jnp.allclose(out1, ref1, atol=1e-2, rtol=1e-2)), \
        float(jnp.max(jnp.abs(out1 - ref1)))

    print("KERNEL_OK")
</pallas_src>

<mosaic_0001>
module attributes {stable_mosaic.version = 11 : i64} {
  func.func @_conv_kxk_im2col_kernel(%arg0: i32, %arg1: memref<2x4x256xf32, #tpu.memory_space<vmem>>, %arg2: memref<8x72xf32, #tpu.memory_space<vmem>>, %arg3: memref<8x1xf32, #tpu.memory_space<vmem>>, %arg4: memref<2x8x256xf32, #tpu.memory_space<vmem>>, %arg5: memref<2x8x326xf32, #tpu.memory_space<vmem>>, %arg6: memref<72x576xf32, #tpu.memory_space<vmem>>) attributes {dimension_semantics = [#tpu.dimension_semantics<parallel>], iteration_bounds = array<i64: 1>, scalar_prefetch = 0 : i64, scratch_operands = 2 : i64, tpu.core_type = #tpu.core_type<tc>, window_params = [{transform_indices = @transform_0, window_bounds = array<i64: 2, 4, 256>}, {pipeline_mode = #tpu.pipeline_mode<synchronous>, transform_indices = @transform_1, window_bounds = array<i64: 8, 72>}, {pipeline_mode = #tpu.pipeline_mode<synchronous>, transform_indices = @transform_2, window_bounds = array<i64: 8, 1>}, {transform_indices = @transform_3, window_bounds = array<i64: 2, 8, 256>}]} {
    %cst = arith.constant 0.000000e+00 : f32
    %0 = vector.broadcast %cst : f32 to vector<4x326xf32>
    %c0 = arith.constant 0 : index
    %c4 = arith.constant 4 : index
    %c0_0 = arith.constant 0 : index
    %1 = vector.load %arg5[%c0, %c4, %c0_0] : memref<2x8x326xf32, #tpu.memory_space<vmem>>, vector<1x4x326xf32>
    %2 = vector.shape_cast %1 : vector<1x4x326xf32> to vector<4x326xf32>
    %3 = vector.shape_cast %0 : vector<4x326xf32> to vector<1x4x326xf32>
    tpu.vector_store %arg5[%c0, %c4, %c0_0], %3 {strides = array<i32>} : memref<2x8x326xf32, #tpu.memory_space<vmem>>, vector<1x4x326xf32>,
    %cst_1 = arith.constant 0.000000e+00 : f32
    %4 = vector.broadcast %cst_1 : f32 to vector<4x19xf32>
    %c0_2 = arith.constant 0 : index
    %c0_3 = arith.constant 0 : index
    %c0_4 = arith.constant 0 : index
    %5 = vector.load %arg5[%c0_2, %c0_3, %c0_4] : memref<2x8x326xf32, #tpu.memory_space<vmem>>, vector<1x4x19xf32>
    %6 = vector.shape_cast %5 : vector<1x4x19xf32> to vector<4x19xf32>
    %7 = vector.shape_cast %4 : vector<4x19xf32> to vector<1x4x19xf32>
    tpu.vector_store %arg5[%c0_2, %c0_3, %c0_4], %7 {strides = array<i32>} : memref<2x8x326xf32, #tpu.memory_space<vmem>>, vector<1x4x19xf32>,
    %cst_5 = arith.constant 0.000000e+00 : f32
    %8 = vector.broadcast %cst_5 : f32 to vector<4x21xf32>
    %c0_6 = arith.constant 0 : index
    %c0_7 = arith.constant 0 : index
    %c305 = arith.constant 305 : index
    %9 = vector.load %arg5[%c0_6, %c0_7, %c305] : memref<2x8x326xf32, #tpu.memory_space<vmem>>, vector<1x4x21xf32>
    %10 = vector.shape_cast %9 : vector<1x4x21xf32> to vector<4x21xf32>
    %11 = vector.shape_cast %8 : vector<4x21xf32> to vector<1x4x21xf32>
    tpu.vector_store %arg5[%c0_6, %c0_7, %c305], %11 {strides = array<i32>} : memref<2x8x326xf32, #tpu.memory_space<vmem>>, vector<1x4x21xf32>,
    %cst_8 = arith.constant 0.000000e+00 : f32
    %12 = vector.broadcast %cst_8 : f32 to vector<4x2xf32>
    %c0_9 = arith.constant 0 : index
    %c0_10 = arith.constant 0 : index
    %c35 = arith.constant 35 : index
    %13 = vector.load %arg5[%c0_9, %c0_10, %c35] : memref<2x8x326xf32, #tpu.memory_space<vmem>>, vector<1x4x2xf32>
    %14 = vector.shape_cast %13 : vector<1x4x2xf32> to vector<4x2xf32>
    %15 = vector.shape_cast %12 : vector<4x2xf32> to vector<1x4x2xf32>
    tpu.vector_store %arg5[%c0_9, %c0_10, %c35], %15 {strides = array<i32>} : memref<2x8x326xf32, #tpu.memory_space<vmem>>, vector<1x4x2xf32>,
    %c0_11 = arith.constant 0 : index
    %c0_12 = arith.constant 0 : index
    %c53 = arith.constant 53 : index
    %16 = vector.load %arg5[%c0_11, %c0_12, %c53] : memref<2x8x326xf32, #tpu.memory_space<vmem>>, vector<1x4x2xf32>
    %17 = vector.shape_cast %16 : vector<1x4x2xf32> to vector<4x2xf32>
    %18 = vector.shape_cast %12 : vector<4x2xf32> to vector<1x4x2xf32>
    tpu.vector_store %arg5[%c0_11, %c0_12, %c53], %18 {strides = array<i32>} : memref<2x8x326xf32, #tpu.memory_space<vmem>>, vector<1x4x2xf32>,
    %c0_13 = arith.constant 0 : index
    %c0_14 = arith.constant 0 : index
    %c71 = arith.constant 71 : index
    %19 = vector.load %arg5[%c0_13, %c0_14, %c71] : memref<2x8x326xf32, #tpu.memory_space<vmem>>, vector<1x4x2xf32>
    %20 = vector.shape_cast %19 : vector<1x4x2xf32> to vector<4x2xf32>
    %21 = vector.shape_cast %12 : vector<4x2xf32> to vector<1x4x2xf32>
    tpu.vector_store %arg5[%c0_13, %c0_14, %c71], %21 {strides = array<i32>} : memref<2x8x326xf32, #tpu.memory_space<vmem>>, vector<1x4x2xf32>,
    %c0_15 = arith.constant 0 : index
    %c0_16 = arith.constant 0 : index
    %c89 = arith.constant 89 : index
    %22 = vector.load %arg5[%c0_15, %c0_16, %c89] : memref<2x8x326xf32, #tpu.memory_space<vmem>>, vector<1x4x2xf32>
    %23 = vector.shape_cast %22 : vector<1x4x2xf32> to vector<4x2xf32>
    %24 = vector.shape_cast %12 : vector<4x2xf32> to vector<1x4x2xf32>
    tpu.vector_store %arg5[%c0_15, %c0_16, %c89], %24 {strides = array<i32>} : memref<2x8x326xf32, #tpu.memory_space<vmem>>, vector<1x4x2xf32>,
    %c0_17 = arith.constant 0 : index
    %c0_18 = arith.constant 0 : index
    %c107 = arith.constant 107 : index
    %25 = vector.load %arg5[%c0_17, %c0_18, %c107] : memref<2x8x326xf32, #tpu.memory_space<vmem>>, vector<1x4x2xf32>
    %26 = vector.shape_cast %25 : vector<1x4x2xf32> to vector<4x2xf32>
    %27 = vector.shape_cast %12 : vector<4x2xf32> to vector<1x4x2xf32>
    tpu.vector_store %arg5[%c0_17, %c0_18, %c107], %27 {strides = array<i32>} : memref<2x8x326xf32, #tpu.memory_space<vmem>>, vector<1x4x2xf32>,
    %c0_19 = arith.constant 0 : index
    %c0_20 = arith.constant 0 : index
    %c125 = arith.constant 125 : index
    %28 = vector.load %arg5[%c0_19, %c0_20, %c125] : memref<2x8x326xf32, #tpu.memory_space<vmem>>, vector<1x4x2xf32>
    %29 = vector.shape_cast %28 : vector<1x4x2xf32> to vector<4x2xf32>
    %30 = vector.shape_cast %12 : vector<4x2xf32> to vector<1x4x2xf32>
    tpu.vector_store %arg5[%c0_19, %c0_20, %c125], %30 {strides = array<i32>} : memref<2x8x326xf32, #tpu.memory_space<vmem>>, vector<1x4x2xf32>,
    %c0_21 = arith.constant 0 : index
    %c0_22 = arith.constant 0 : index
    %c143 = arith.constant 143 : index
    %31 = vector.load %arg5[%c0_21, %c0_22, %c143] : memref<2x8x326xf32, #tpu.memory_space<vmem>>, vector<1x4x2xf32>
    %32 = vector.shape_cast %31 : vector<1x4x2xf32> to vector<4x2xf32>
    %33 = vector.shape_cast %12 : vector<4x2xf32> to vector<1x4x2xf32>
    tpu.vector_store %arg5[%c0_21, %c0_22, %c143], %33 {strides = array<i32>} : memref<2x8x326xf32, #tpu.memory_space<vmem>>, vector<1x4x2xf32>,
    %c0_23 = arith.constant 0 : index
    %c0_24 = arith.constant 0 : index
    %c161 = arith.constant 161 : index
    %34 = vector.load %arg5[%c0_23, %c0_24, %c161] : memref<2x8x326xf32, #tpu.memory_space<vmem>>, vector<1x4x2xf32>
    %35 = vector.shape_cast %34 : vector<1x4x2xf32> to vector<4x2xf32>
    %36 = vector.shape_cast %12 : vector<4x2xf32> to vector<1x4x2xf32>
    tpu.vector_store %arg5[%c0_23, %c0_24, %c161], %36 {strides = array<i32>} : memref<2x8x326xf32, #tpu.memory_space<vmem>>, vector<1x4x2xf32>,
    %c0_25 = arith.constant 0 : index
    %c0_26 = arith.constant 0 : index
    %c179 = arith.constant 179 : index
    %37 = vector.load %arg5[%c0_25, %c0_26, %c179] : memref<2x8x326xf32, #tpu.memory_space<vmem>>, vector<1x4x2xf32>
    %38 = vector.shape_cast %37 : vector<1x4x2xf32> to vector<4x2xf32>
    %39 = vector.shape_cast %12 : vector<4x2xf32> to vector<1x4x2xf32>
    tpu.vector_store %arg5[%c0_25, %c0_26, %c179], %39 {strides = array<i32>} : memref<2x8x326xf32, #tpu.memory_space<vmem>>, vector<1x4x2xf32>,
    %c0_27 = arith.constant 0 : index
    %c0_28 = arith.constant 0 : index
    %c197 = arith.constant 197 : index
    %40 = vector.load %arg5[%c0_27, %c0_28, %c197] : memref<2x8x326xf32, #tpu.memory_space<vmem>>, vector<1x4x2xf32>
    %41 = vector.shape_cast %40 : vector<1x4x2xf32> to vector<4x2xf32>
    %42 = vector.shape_cast %12 : vector<4x2xf32> to vector<1x4x2xf32>
    tpu.vector_store %arg5[%c0_27, %c0_28, %c197], %42 {strides = array<i32>} : memref<2x8x326xf32, #tpu.memory_space<vmem>>, vector<1x4x2xf32>,
    %c0_29 = arith.constant 0 : index
    %c0_30 = arith.constant 0 : index
    %c215 = arith.constant 215 : index
    %43 = vector.load %arg5[%c0_29, %c0_30, %c215] : memref<2x8x326xf32, #tpu.memory_space<vmem>>, vector<1x4x2xf32>
    %44 = vector.shape_cast %43 : vector<1x4x2xf32> to vector<4x2xf32>
    %45 = vector.shape_cast %12 : vector<4x2xf32> to vector<1x4x2xf32>
    tpu.vector_store %arg5[%c0_29, %c0_30, %c215], %45 {strides = array<i32>} : memref<2x8x326xf32, #tpu.memory_space<vmem>>, vector<1x4x2xf32>,
    %c0_31 = arith.constant 0 : index
    %c0_32 = arith.constant 0 : index
    %c233 = arith.constant 233 : index
    %46 = vector.load %arg5[%c0_31, %c0_32, %c233] : memref<2x8x326xf32, #tpu.memory_space<vmem>>, vector<1x4x2xf32>
    %47 = vector.shape_cast %46 : vector<1x4x2xf32> to vector<4x2xf32>
    %48 = vector.shape_cast %12 : vector<4x2xf32> to vector<1x4x2xf32>
    tpu.vector_store %arg5[%c0_31, %c0_32, %c233], %48 {strides = array<i32>} : memref<2x8x326xf32, #tpu.memory_space<vmem>>, vector<1x4x2xf32>,
    %c0_33 = arith.constant 0 : index
    %c0_34 = arith.constant 0 : index
    %c251 = arith.constant 251 : index
    %49 = vector.load %arg5[%c0_33, %c0_34, %c251] : memref<2x8x326xf32, #tpu.memory_space<vmem>>, vector<1x4x2xf32>
    %50 = vector.shape_cast %49 : vector<1x4x2xf32> to vector<4x2xf32>
    %51 = vector.shape_cast %12 : vector<4x2xf32> to vector<1x4x2xf32>
    tpu.vector_store %arg5[%c0_33, %c0_34, %c251], %51 {strides = array<i32>} : memref<2x8x326xf32, #tpu.memory_space<vmem>>, vector<1x4x2xf32>,
    %c0_35 = arith.constant 0 : index
    %c0_36 = arith.constant 0 : index
    %c269 = arith.constant 269 : index
    %52 = vector.load %arg5[%c0_35, %c0_36, %c269] : memref<2x8x326xf32, #tpu.memory_space<vmem>>, vector<1x4x2xf32>
    %53 = vector.shape_cast %52 : vector<1x4x2xf32> to vector<4x2xf32>
    %54 = vector.shape_cast %12 : vector<4x2xf32> to vector<1x4x2xf32>
    tpu.vector_store %arg5[%c0_35, %c0_36, %c269], %54 {strides = array<i32>} : memref<2x8x326xf32, #tpu.memory_space<vmem>>, vector<1x4x2xf32>,
    %c0_37 = arith.constant 0 : index
    %c0_38 = arith.constant 0 : index
    %c287 = arith.constant 287 : index
    %55 = vector.load %arg5[%c0_37, %c0_38, %c287] : memref<2x8x326xf32, #tpu.memory_space<vmem>>, vector<1x4x2xf32>
    %56 = vector.shape_cast %55 : vector<1x4x2xf32> to vector<4x2xf32>
    %57 = vector.shape_cast %12 : vector<4x2xf32> to vector<1x4x2xf32>
    tpu.vector_store %arg5[%c0_37, %c0_38, %c287], %57 {strides = array<i32>} : memref<2x8x326xf32, #tpu.memory_space<vmem>>, vector<1x4x2xf32>,
    %c0_39 = arith.constant 0 : index
    %c0_40 = arith.constant 0 : index
    %c0_41 = arith.constant 0 : index
    %58 = vector.load %arg1[%c0_39, %c0_40, %c0_41] : memref<2x4x256xf32, #tpu.memory_space<vmem>>, vector<1x4x256xf32>
    %59 = vector.shape_cast %58 : vector<1x4x256xf32> to vector<4x256xf32>
    %60 = vector.extract_strided_slice %59 {offsets = [0, 0], sizes = [4, 16], strides = [1, 1]} : vector<4x256xf32> to vector<4x16xf32>
    %c0_42 = arith.constant 0 : index
    %c0_43 = arith.constant 0 : index
    %c19 = arith.constant 19 : index
    %61 = vector.load %arg5[%c0_42, %c0_43, %c19] : memref<2x8x326xf32, #tpu.memory_space<vmem>>, vector<1x4x16xf32>
    %62 = vector.shape_cast %61 : vector<1x4x16xf32> to vector<4x16xf32>
    %63 = vector.shape_cast %60 : vector<4x16xf32> to vector<1x4x16xf32>
    tpu.vector_store %arg5[%c0_42, %c0_43, %c19], %63 {strides = array<i32>} : memref<2x8x326xf32, #tpu.memory_space<vmem>>, vector<1x4x16xf32>,
    %64 = vector.extract_strided_slice %59 {offsets = [0, 16], sizes = [4, 16], strides = [1, 1]} : vector<4x256xf32> to vector<4x16xf32>
    %c0_44 = arith.constant 0 : index
    %c0_45 = arith.constant 0 : index
    %c37 = arith.constant 37 : index
    %65 = vector.load %arg5[%c0_44, %c0_45, %c37] : memref<2x8x326xf32, #tpu.memory_space<vmem>>, vector<1x4x16xf32>
    %66 = vector.shape_cast %65 : vector<1x4x16xf32> to vector<4x16xf32>
    %67 = vector.shape_cast %64 : vector<4x16xf32> to vector<1x4x16xf32>
    tpu.vector_store %arg5[%c0_44, %c0_45, %c37], %67 {strides = array<i32>} : memref<2x8x326xf32, #tpu.memory_space<vmem>>, vector<1x4x16xf32>,
    %68 = vector.extract_strided_slice %59 {offsets = [0, 32], sizes = [4, 16], strides = [1, 1]} : vector<4x256xf32> to vector<4x16xf32>
    %c0_46 = arith.constant 0 : index
    %c0_47 = arith.constant 0 : index
    %c55 = arith.constant 55 : index
    %69 = vector.load %arg5[%c0_46, %c0_47, %c55] : memref<2x8x326xf32, #tpu.memory_space<vmem>>, vector<1x4x16xf32>
    %70 = vector.shape_cast %69 : vector<1x4x16xf32> to vector<4x16xf32>
    %71 = vector.shape_cast %68 : vector<4x16xf32> to vector<1x4x16xf32>
    tpu.vector_store %arg5[%c0_46, %c0_47, %c55], %71 {strides = array<i32>} : memref<2x8x326xf32, #tpu.memory_space<vmem>>, vector<1x4x16xf32>,
    %72 = vector.extract_strided_slice %59 {offsets = [0, 48], sizes = [4, 16], strides = [1, 1]} : vector<4x256xf32> to vector<4x16xf32>
    %c0_48 = arith.constant 0 : index
    %c0_49 = arith.constant 0 : index
    %c73 = arith.constant 73 : index
    %73 = vector.load %arg5[%c0_48, %c0_49, %c73] : memref<2x8x326xf32, #tpu.memory_space<vmem>>, vector<1x4x16xf32>
    %74 = vector.shape_cast %73 : vector<1x4x16xf32> to vector<4x16xf32>
    %75 = vector.shape_cast %72 : vector<4x16xf32> to vector<1x4x16xf32>
    tpu.vector_store %arg5[%c0_48, %c0_49, %c73], %75 {strides = array<i32>} : memref<2x8x326xf32, #tpu.memory_space<vmem>>, vector<1x4x16xf32>,
    %76 = vector.extract_strided_slice %59 {offsets = [0, 64], sizes = [4, 16], strides = [1, 1]} : vector<4x256xf32> to vector<4x16xf32>
    %c0_50 = arith.constant 0 : index
    %c0_51 = arith.constant 0 : index
    %c91 = arith.constant 91 : index
    %77 = vector.load %arg5[%c0_50, %c0_51, %c91] : memref<2x8x326xf32, #tpu.memory_space<vmem>>, vector<1x4x16xf32>
    %78 = vector.shape_cast %77 : vector<1x4x16xf32> to vector<4x16xf32>
    %79 = vector.shape_cast %76 : vector<4x16xf32> to vector<1x4x16xf32>
    tpu.vector_store %arg5[%c0_50, %c0_51, %c91], %79 {strides = array<i32>} : memref<2x8x326xf32, #tpu.memory_space<vmem>>, vector<1x4x16xf32>,
    %80 = vector.extract_strided_slice %59 {offsets = [0, 80], sizes = [4, 16], strides = [1, 1]} : vector<4x256xf32> to vector<4x16xf32>
    %c0_52 = arith.constant 0 : index
    %c0_53 = arith.constant 0 : index
    %c109 = arith.constant 109 : index
    %81 = vector.load %arg5[%c0_52, %c0_53, %c109] : memref<2x8x326xf32, #tpu.memory_space<vmem>>, vector<1x4x16xf32>
    %82 = vector.shape_cast %81 : vector<1x4x16xf32> to vector<4x16xf32>
    %83 = vector.shape_cast %80 : vector<4x16xf32> to vector<1x4x16xf32>
    tpu.vector_store %arg5[%c0_52, %c0_53, %c109], %83 {strides = array<i32>} : memref<2x8x326xf32, #tpu.memory_space<vmem>>, vector<1x4x16xf32>,
    %84 = vector.extract_strided_slice %59 {offsets = [0, 96], sizes = [4, 16], strides = [1, 1]} : vector<4x256xf32> to vector<4x16xf32>
    %c0_54 = arith.constant 0 : index
    %c0_55 = arith.constant 0 : index
    %c127 = arith.constant 127 : index
    %85 = vector.load %arg5[%c0_54, %c0_55, %c127] : memref<2x8x326xf32, #tpu.memory_space<vmem>>, vector<1x4x16xf32>
    %86 = vector.shape_cast %85 : vector<1x4x16xf32> to vector<4x16xf32>
    %87 = vector.shape_cast %84 : vector<4x16xf32> to vector<1x4x16xf32>
    tpu.vector_store %arg5[%c0_54, %c0_55, %c127], %87 {strides = array<i32>} : memref<2x8x326xf32, #tpu.memory_space<vmem>>, vector<1x4x16xf32>,
    %88 = vector.extract_strided_slice %59 {offsets = [0, 112], sizes = [4, 16], strides = [1, 1]} : vector<4x256xf32> to vector<4x16xf32>
    %c0_56 = arith.constant 0 : index
    %c0_57 = arith.constant 0 : index
    %c145 = arith.constant 145 : index
    %89 = vector.load %arg5[%c0_56, %c0_57, %c145] : memref<2x8x326xf32, #tpu.memory_space<vmem>>, vector<1x4x16xf32>
    %90 = vector.shape_cast %89 : vector<1x4x16xf32> to vector<4x16xf32>
    %91 = vector.shape_cast %88 : vector<4x16xf32> to vector<1x4x16xf32>
    tpu.vector_store %arg5[%c0_56, %c0_57, %c145], %91 {strides = array<i32>} : memref<2x8x326xf32, #tpu.memory_space<vmem>>, vector<1x4x16xf32>,
    %92 = vector.extract_strided_slice %59 {offsets = [0, 128], sizes = [4, 16], strides = [1, 1]} : vector<4x256xf32> to vector<4x16xf32>
    %c0_58 = arith.constant 0 : index
    %c0_59 = arith.constant 0 : index
    %c163 = arith.constant 163 : index
    %93 = vector.load %arg5[%c0_58, %c0_59, %c163] : memref<2x8x326xf32, #tpu.memory_space<vmem>>, vector<1x4x16xf32>
    %94 = vector.shape_cast %93 : vector<1x4x16xf32> to vector<4x16xf32>
    %95 = vector.shape_cast %92 : vector<4x16xf32> to vector<1x4x16xf32>
    tpu.vector_store %arg5[%c0_58, %c0_59, %c163], %95 {strides = array<i32>} : memref<2x8x326xf32, #tpu.memory_space<vmem>>, vector<1x4x16xf32>,
    %96 = vector.extract_strided_slice %59 {offsets = [0, 144], sizes = [4, 16], strides = [1, 1]} : vector<4x256xf32> to vector<4x16xf32>
    %c0_60 = arith.constant 0 : index
    %c0_61 = arith.constant 0 : index
    %c181 = arith.constant 181 : index
    %97 = vector.load %arg5[%c0_60, %c0_61, %c181] : memref<2x8x326xf32, #tpu.memory_space<vmem>>, vector<1x4x16xf32>
    %98 = vector.shape_cast %97 : vector<1x4x16xf32> to vector<4x16xf32>
    %99 = vector.shape_cast %96 : vector<4x16xf32> to vector<1x4x16xf32>
    tpu.vector_store %arg5[%c0_60, %c0_61, %c181], %99 {strides = array<i32>} : memref<2x8x326xf32, #tpu.memory_space<vmem>>, vector<1x4x16xf32>,
    %100 = vector.extract_strided_slice %59 {offsets = [0, 160], sizes = [4, 16], strides = [1, 1]} : vector<4x256xf32> to vector<4x16xf32>
    %c0_62 = arith.constant 0 : index
    %c0_63 = arith.constant 0 : index
    %c199 = arith.constant 199 : index
    %101 = vector.load %arg5[%c0_62, %c0_63, %c199] : memref<2x8x326xf32, #tpu.memory_space<vmem>>, vector<1x4x16xf32>
    %102 = vector.shape_cast %101 : vector<1x4x16xf32> to vector<4x16xf32>
    %103 = vector.shape_cast %100 : vector<4x16xf32> to vector<1x4x16xf32>
    tpu.vector_store %arg5[%c0_62, %c0_63, %c199], %103 {strides = array<i32>} : memref<2x8x326xf32, #tpu.memory_space<vmem>>, vector<1x4x16xf32>,
    %104 = vector.extract_strided_slice %59 {offsets = [0, 176], sizes = [4, 16], strides = [1, 1]} : vector<4x256xf32> to vector<4x16xf32>
    %c0_64 = arith.constant 0 : index
    %c0_65 = arith.constant 0 : index
    %c217 = arith.constant 217 : index
    %105 = vector.load %arg5[%c0_64, %c0_65, %c217] : memref<2x8x326xf32, #tpu.memory_space<vmem>>, vector<1x4x16xf32>
    %106 = vector.shape_cast %105 : vector<1x4x16xf32> to vector<4x16xf32>
    %107 = vector.shape_cast %104 : vector<4x16xf32> to vector<1x4x16xf32>
    tpu.vector_store %arg5[%c0_64, %c0_65, %c217], %107 {strides = array<i32>} : memref<2x8x326xf32, #tpu.memory_space<vmem>>, vector<1x4x16xf32>,
    %108 = vector.extract_strided_slice %59 {offsets = [0, 192], sizes = [4, 16], strides = [1, 1]} : vector<4x256xf32> to vector<4x16xf32>
    %c0_66 = arith.constant 0 : index
    %c0_67 = arith.constant 0 : index
    %c235 = arith.constant 235 : index
    %109 = vector.load %arg5[%c0_66, %c0_67, %c235] : memref<2x8x326xf32, #tpu.memory_space<vmem>>, vector<1x4x16xf32>
    %110 = vector.shape_cast %109 : vector<1x4x16xf32> to vector<4x16xf32>
    %111 = vector.shape_cast %108 : vector<4x16xf32> to vector<1x4x16xf32>
    tpu.vector_store %arg5[%c0_66, %c0_67, %c235], %111 {strides = array<i32>} : memref<2x8x326xf32, #tpu.memory_space<vmem>>, vector<1x4x16xf32>,
    %112 = vector.extract_strided_slice %59 {offsets = [0, 208], sizes = [4, 16], strides = [1, 1]} : vector<4x256xf32> to vector<4x16xf32>
    %c0_68 = arith.constant 0 : index
    %c0_69 = arith.constant 0 : index
    %c253 = arith.constant 253 : index
    %113 = vector.load %arg5[%c0_68, %c0_69, %c253] : memref<2x8x326xf32, #tpu.memory_space<vmem>>, vector<1x4x16xf32>
    %114 = vector.shape_cast %113 : vector<1x4x16xf32> to vector<4x16xf32>
    %115 = vector.shape_cast %112 : vector<4x16xf32> to vector<1x4x16xf32>
    tpu.vector_store %arg5[%c0_68, %c0_69, %c253], %115 {strides = array<i32>} : memref<2x8x326xf32, #tpu.memory_space<vmem>>, vector<1x4x16xf32>,
    %116 = vector.extract_strided_slice %59 {offsets = [0, 224], sizes = [4, 16], strides = [1, 1]} : vector<4x256xf32> to vector<4x16xf32>
    %c0_70 = arith.constant 0 : index
    %c0_71 = arith.constant 0 : index
    %c271 = arith.constant 271 : index
    %117 = vector.load %arg5[%c0_70, %c0_71, %c271] : memref<2x8x326xf32, #tpu.memory_space<vmem>>, vector<1x4x16xf32>
    %118 = vector.shape_cast %117 : vector<1x4x16xf32> to vector<4x16xf32>
    %119 = vector.shape_cast %116 : vector<4x16xf32> to vector<1x4x16xf32>
    tpu.vector_store %arg5[%c0_70, %c0_71, %c271], %119 {strides = array<i32>} : memref<2x8x326xf32, #tpu.memory_space<vmem>>, vector<1x4x16xf32>,
    %120 = vector.extract_strided_slice %59 {offsets = [0, 240], sizes = [4, 16], strides = [1, 1]} : vector<4x256xf32> to vector<4x16xf32>
    %c0_72 = arith.constant 0 : index
    %c0_73 = arith.constant 0 : index
    %c289 = arith.constant 289 : index
    %121 = vector.load %arg5[%c0_72, %c0_73, %c289] : memref<2x8x326xf32, #tpu.memory_space<vmem>>, vector<1x4x16xf32>
    %122 = vector.shape_cast %121 : vector<1x4x16xf32> to vector<4x16xf32>
    %123 = vector.shape_cast %120 : vector<4x16xf32> to vector<1x4x16xf32>
    tpu.vector_store %arg5[%c0_72, %c0_73, %c289], %123 {strides = array<i32>} : memref<2x8x326xf32, #tpu.memory_space<vmem>>, vector<1x4x16xf32>,
    %cst_74 = arith.constant 0.000000e+00 : f32
    %124 = vector.broadcast %cst_74 : f32 to vector<4x326xf32>
    %c1 = arith.constant 1 : index
    %c4_75 = arith.constant 4 : index
    %c0_76 = arith.constant 0 : index
    %125 = vector.load %arg5[%c1, %c4_75, %c0_76] : memref<2x8x326xf32, #tpu.memory_space<vmem>>, vector<1x4x326xf32>
    %126 = vector.shape_cast %125 : vector<1x4x326xf32> to vector<4x326xf32>
    %127 = vector.shape_cast %124 : vector<4x326xf32> to vector<1x4x326xf32>
    tpu.vector_store %arg5[%c1, %c4_75, %c0_76], %127 {strides = array<i32>} : memref<2x8x326xf32, #tpu.memory_space<vmem>>, vector<1x4x326xf32>,
    %cst_77 = arith.constant 0.000000e+00 : f32
    %128 = vector.broadcast %cst_77 : f32 to vector<4x19xf32>
    %c1_78 = arith.constant 1 : index
    %c0_79 = arith.constant 0 : index
    %c0_80 = arith.constant 0 : index
    %129 = vector.load %arg5[%c1_78, %c0_79, %c0_80] : memref<2x8x326xf32, #tpu.memory_space<vmem>>, vector<1x4x19xf32>
    %130 = vector.shape_cast %129 : vector<1x4x19xf32> to vector<4x19xf32>
    %131 = vector.shape_cast %128 : vector<4x19xf32> to vector<1x4x19xf32>
    tpu.vector_store %arg5[%c1_78, %c0_79, %c0_80], %131 {strides = array<i32>} : memref<2x8x326xf32, #tpu.memory_space<vmem>>, vector<1x4x19xf32>,
    %cst_81 = arith.constant 0.000000e+00 : f32
    %132 = vector.broadcast %cst_81 : f32 to vector<4x21xf32>
    %c1_82 = arith.constant 1 : index
    %c0_83 = arith.constant 0 : index
    %c305_84 = arith.constant 305 : index
    %133 = vector.load %arg5[%c1_82, %c0_83, %c305_84] : memref<2x8x326xf32, #tpu.memory_space<vmem>>, vector<1x4x21xf32>
    %134 = vector.shape_cast %133 : vector<1x4x21xf32> to vector<4x21xf32>
    %135 = vector.shape_cast %132 : vector<4x21xf32> to vector<1x4x21xf32>
    tpu.vector_store %arg5[%c1_82, %c0_83, %c305_84], %135 {strides = array<i32>} : memref<2x8x326xf32, #tpu.memory_space<vmem>>, vector<1x4x21xf32>,
    %cst_85 = arith.constant 0.000000e+00 : f32
    %136 = vector.broadcast %cst_85 : f32 to vector<4x2xf32>
    %c1_86 = arith.constant 1 : index
    %c0_87 = arith.constant 0 : index
    %c35_88 = arith.constant 35 : index
    %137 = vector.load %arg5[%c1_86, %c0_87, %c35_88] : memref<2x8x326xf32, #tpu.memory_space<vmem>>, vector<1x4x2xf32>
    %138 = vector.shape_cast %137 : vector<1x4x2xf32> to vector<4x2xf32>
    %139 = vector.shape_cast %136 : vector<4x2xf32> to vector<1x4x2xf32>
    tpu.vector_store %arg5[%c1_86, %c0_87, %c35_88], %139 {strides = array<i32>} : memref<2x8x326xf32, #tpu.memory_space<vmem>>, vector<1x4x2xf32>,
    %c1_89 = arith.constant 1 : index
    %c0_90 = arith.constant 0 : index
    %c53_91 = arith.constant 53 : index
    %140 = vector.load %arg5[%c1_89, %c0_90, %c53_91] : memref<2x8x326xf32, #tpu.memory_space<vmem>>, vector<1x4x2xf32>
    %141 = vector.shape_cast %140 : vector<1x4x2xf32> to vector<4x2xf32>
    %142 = vector.shape_cast %136 : vector<4x2xf32> to vector<1x4x2xf32>
    tpu.vector_store %arg5[%c1_89, %c0_90, %c53_91], %142 {strides = array<i32>} : memref<2x8x326xf32, #tpu.memory_space<vmem>>, vector<1x4x2xf32>,
    %c1_92 = arith.constant 1 : index
    %c0_93 = arith.constant 0 : index
    %c71_94 = arith.constant 71 : index
    %143 = vector.load %arg5[%c1_92, %c0_93, %c71_94] : memref<2x8x326xf32, #tpu.memory_space<vmem>>, vector<1x4x2xf32>
    %144 = vector.shape_cast %143 : vector<1x4x2xf32> to vector<4x2xf32>
    %145 = vector.shape_cast %136 : vector<4x2xf32> to vector<1x4x2xf32>
    tpu.vector_store %arg5[%c1_92, %c0_93, %c71_94], %145 {strides = array<i32>} : memref<2x8x326xf32, #tpu.memory_space<vmem>>, vector<1x4x2xf32>,
    %c1_95 = arith.constant 1 : index
    %c0_96 = arith.constant 0 : index
    %c89_97 = arith.constant 89 : index
    %146 = vector.load %arg5[%c1_95, %c0_96, %c89_97] : memref<2x8x326xf32, #tpu.memory_space<vmem>>, vector<1x4x2xf32>
    %147 = vector.shape_cast %146 : vector<1x4x2xf32> to vector<4x2xf32>
    %148 = vector.shape_cast %136 : vector<4x2xf32> to vector<1x4x2xf32>
    tpu.vector_store %arg5[%c1_95, %c0_96, %c89_97], %148 {strides = array<i32>} : memref<2x8x326xf32, #tpu.memory_space<vmem>>, vector<1x4x2xf32>,
    %c1_98 = arith.constant 1 : index
    %c0_99 = arith.constant 0 : index
    %c107_100 = arith.constant 107 : index
    %149 = vector.load %arg5[%c1_98, %c0_99, %c107_100] : memref<2x8x326xf32, #tpu.memory_space<vmem>>, vector<1x4x2xf32>
    %150 = vector.shape_cast %149 : vector<1x4x2xf32> to vector<4x2xf32>
    %151 = vector.shape_cast %136 : vector<4x2xf32> to vector<1x4x2xf32>
    tpu.vector_store %arg5[%c1_98, %c0_99, %c107_100], %151 {strides = array<i32>} : memref<2x8x326xf32, #tpu.memory_space<vmem>>, vector<1x4x2xf32>,
    %c1_101 = arith.constant 1 : index
    %c0_102 = arith.constant 0 : index
    %c125_103 = arith.constant 125 : index
    %152 = vector.load %arg5[%c1_101, %c0_102, %c125_103] : memref<2x8x326xf32, #tpu.memory_space<vmem>>, vector<1x4x2xf32>
    %153 = vector.shape_cast %152 : vector<1x4x2xf32> to vector<4x2xf32>
    %154 = vector.shape_cast %136 : vector<4x2xf32> to vector<1x4x2xf32>
    tpu.vector_store %arg5[%c1_101, %c0_102, %c125_103], %154 {strides = array<i32>} : memref<2x8x326xf32, #tpu.memory_space<vmem>>, vector<1x4x2xf32>,
    %c1_104 = arith.constant 1 : index
    %c0_105 = arith.constant 0 : index
    %c143_106 = arith.constant 143 : index
    %155 = vector.load %arg5[%c1_104, %c0_105, %c143_106] : memref<2x8x326xf32, #tpu.memory_space<vmem>>, vector<1x4x2xf32>
    %156 = vector.shape_cast %155 : vector<1x4x2xf32> to vector<4x2xf32>
    %157 = vector.shape_cast %136 : vector<4x2xf32> to vector<1x4x2xf32>
    tpu.vector_store %arg5[%c1_104, %c0_105, %c143_106], %157 {strides = array<i32>} : memref<2x8x326xf32, #tpu.memory_space<vmem>>, vector<1x4x2xf32>,
    %c1_107 = arith.constant 1 : index
    %c0_108 = arith.constant 0 : index
    %c161_109 = arith.constant 161 : index
    %158 = vector.load %arg5[%c1_107, %c0_108, %c161_109] : memref<2x8x326xf32, #tpu.memory_space<vmem>>, vector<1x4x2xf32>
    %159 = vector.shape_cast %158 : vector<1x4x2xf32> to vector<4x2xf32>
    %160 = vector.shape_cast %136 : vector<4x2xf32> to vector<1x4x2xf32>
    tpu.vector_store %arg5[%c1_107, %c0_108, %c161_109], %160 {strides = array<i32>} : memref<2x8x326xf32, #tpu.memory_space<vmem>>, vector<1x4x2xf32>,
    %c1_110 = arith.constant 1 : index
    %c0_111 = arith.constant 0 : index
    %c179_112 = arith.constant 179 : index
    %161 = vector.load %arg5[%c1_110, %c0_111, %c179_112] : memref<2x8x326xf32, #tpu.memory_space<vmem>>, vector<1x4x2xf32>
    %162 = vector.shape_cast %161 : vector<1x4x2xf32> to vector<4x2xf32>
    %163 = vector.shape_cast %136 : vector<4x2xf32> to vector<1x4x2xf32>
    tpu.vector_store %arg5[%c1_110, %c0_111, %c179_112], %163 {strides = array<i32>} : memref<2x8x326xf32, #tpu.memory_space<vmem>>, vector<1x4x2xf32>,
    %c1_113 = arith.constant 1 : index
    %c0_114 = arith.constant 0 : index
    %c197_115 = arith.constant 197 : index
    %164 = vector.load %arg5[%c1_113, %c0_114, %c197_115] : memref<2x8x326xf32, #tpu.memory_space<vmem>>, vector<1x4x2xf32>
    %165 = vector.shape_cast %164 : vector<1x4x2xf32> to vector<4x2xf32>
    %166 = vector.shape_cast %136 : vector<4x2xf32> to vector<1x4x2xf32>
    tpu.vector_store %arg5[%c1_113, %c0_114, %c197_115], %166 {strides = array<i32>} : memref<2x8x326xf32, #tpu.memory_space<vmem>>, vector<1x4x2xf32>,
    %c1_116 = arith.constant 1 : index
    %c0_117 = arith.constant 0 : index
    %c215_118 = arith.constant 215 : index
    %167 = vector.load %arg5[%c1_116, %c0_117, %c215_118] : memref<2x8x326xf32, #tpu.memory_space<vmem>>, vector<1x4x2xf32>
    %168 = vector.shape_cast %167 : vector<1x4x2xf32> to vector<4x2xf32>
    %169 = vector.shape_cast %136 : vector<4x2xf32> to vector<1x4x2xf32>
    tpu.vector_store %arg5[%c1_116, %c0_117, %c215_118], %169 {strides = array<i32>} : memref<2x8x326xf32, #tpu.memory_space<vmem>>, vector<1x4x2xf32>,
    %c1_119 = arith.constant 1 : index
    %c0_120 = arith.constant 0 : index
    %c233_121 = arith.constant 233 : index
    %170 = vector.load %arg5[%c1_119, %c0_120, %c233_121] : memref<2x8x326xf32, #tpu.memory_space<vmem>>, vector<1x4x2xf32>
    %171 = vector.shape_cast %170 : vector<1x4x2xf32> to vector<4x2xf32>
    %172 = vector.shape_cast %136 : vector<4x2xf32> to vector<1x4x2xf32>
    tpu.vector_store %arg5[%c1_119, %c0_120, %c233_121], %172 {strides = array<i32>} : memref<2x8x326xf32, #tpu.memory_space<vmem>>, vector<1x4x2xf32>,
    %c1_122 = arith.constant 1 : index
    %c0_123 = arith.constant 0 : index
    %c251_124 = arith.constant 251 : index
    %173 = vector.load %arg5[%c1_122, %c0_123, %c251_124] : memref<2x8x326xf32, #tpu.memory_space<vmem>>, vector<1x4x2xf32>
    %174 = vector.shape_cast %173 : vector<1x4x2xf32> to vector<4x2xf32>
    %175 = vector.shape_cast %136 : vector<4x2xf32> to vector<1x4x2xf32>
    tpu.vector_store %arg5[%c1_122, %c0_123, %c251_124], %175 {strides = array<i32>} : memref<2x8x326xf32, #tpu.memory_space<vmem>>, vector<1x4x2xf32>,
    %c1_125 = arith.constant 1 : index
    %c0_126 = arith.constant 0 : index
    %c269_127 = arith.constant 269 : index
    %176 = vector.load %arg5[%c1_125, %c0_126, %c269_127] : memref<2x8x326xf32, #tpu.memory_space<vmem>>, vector<1x4x2xf32>
    %177 = vector.shape_cast %176 : vector<1x4x2xf32> to vector<4x2xf32>
    %178 = vector.shape_cast %136 : vector<4x2xf32> to vector<1x4x2xf32>
    tpu.vector_store %arg5[%c1_125, %c0_126, %c269_127], %178 {strides = array<i32>} : memref<2x8x326xf32, #tpu.memory_space<vmem>>, vector<1x4x2xf32>,
    %c1_128 = arith.constant 1 : index
    %c0_129 = arith.constant 0 : index
    %c287_130 = arith.constant 287 : index
    %179 = vector.load %arg5[%c1_128, %c0_129, %c287_130] : memref<2x8x326xf32, #tpu.memory_space<vmem>>, vector<1x4x2xf32>
    %180 = vector.shape_cast %179 : vector<1x4x2xf32> to vector<4x2xf32>
    %181 = vector.shape_cast %136 : vector<4x2xf32> to vector<1x4x2xf32>
    tpu.vector_store %arg5[%c1_128, %c0_129, %c287_130], %181 {strides = array<i32>} : memref<2x8x326xf32, #tpu.memory_space<vmem>>, vector<1x4x2xf32>,
    %c1_131 = arith.constant 1 : index
    %c0_132 = arith.constant 0 : index
    %c0_133 = arith.constant 0 : index
    %182 = vector.load %arg1[%c1_131, %c0_132, %c0_133] : memref<2x4x256xf32, #tpu.memory_space<vmem>>, vector<1x4x256xf32>
    %183 = vector.shape_cast %182 : vector<1x4x256xf32> to vector<4x256xf32>
    %184 = vector.extract_strided_slice %183 {offsets = [0, 0], sizes = [4, 16], strides = [1, 1]} : vector<4x256xf32> to vector<4x16xf32>
    %c1_134 = arith.constant 1 : index
    %c0_135 = arith.constant 0 : index
    %c19_136 = arith.constant 19 : index
    %185 = vector.load %arg5[%c1_134, %c0_135, %c19_136] : memref<2x8x326xf32, #tpu.memory_space<vmem>>, vector<1x4x16xf32>
    %186 = vector.shape_cast %185 : vector<1x4x16xf32> to vector<4x16xf32>
    %187 = vector.shape_cast %184 : vector<4x16xf32> to vector<1x4x16xf32>
    tpu.vector_store %arg5[%c1_134, %c0_135, %c19_136], %187 {strides = array<i32>} : memref<2x8x326xf32, #tpu.memory_space<vmem>>, vector<1x4x16xf32>,
    %188 = vector.extract_strided_slice %183 {offsets = [0, 16], sizes = [4, 16], strides = [1, 1]} : vector<4x256xf32> to vector<4x16xf32>
    %c1_137 = arith.constant 1 : index
    %c0_138 = arith.constant 0 : index
    %c37_139 = arith.constant 37 : index
    %189 = vector.load %arg5[%c1_137, %c0_138, %c37_139] : memref<2x8x326xf32, #tpu.memory_space<vmem>>, vector<1x4x16xf32>
    %190 = vector.shape_cast %189 : vector<1x4x16xf32> to vector<4x16xf32>
    %191 = vector.shape_cast %188 : vector<4x16xf32> to vector<1x4x16xf32>
    tpu.vector_store %arg5[%c1_137, %c0_138, %c37_139], %191 {strides = array<i32>} : memref<2x8x326xf32, #tpu.memory_space<vmem>>, vector<1x4x16xf32>,
    %192 = vector.extract_strided_slice %183 {offsets = [0, 32], sizes = [4, 16], strides = [1, 1]} : vector<4x256xf32> to vector<4x16xf32>
    %c1_140 = arith.constant 1 : index
    %c0_141 = arith.constant 0 : index
    %c55_142 = arith.constant 55 : index
    %193 = vector.load %arg5[%c1_140, %c0_141, %c55_142] : memref<2x8x326xf32, #tpu.memory_space<vmem>>, vector<1x4x16xf32>
    %194 = vector.shape_cast %193 : vector<1x4x16xf32> to vector<4x16xf32>
    %195 = vector.shape_cast %192 : vector<4x16xf32> to vector<1x4x16xf32>
    tpu.vector_store %arg5[%c1_140, %c0_141, %c55_142], %195 {strides = array<i32>} : memref<2x8x326xf32, #tpu.memory_space<vmem>>, vector<1x4x16xf32>,
    %196 = vector.extract_strided_slice %183 {offsets = [0, 48], sizes = [4, 16], strides = [1, 1]} : vector<4x256xf32> to vector<4x16xf32>
    %c1_143 = arith.constant 1 : index
    %c0_144 = arith.constant 0 : index
    %c73_145 = arith.constant 73 : index
    %197 = vector.load %arg5[%c1_143, %c0_144, %c73_145] : memref<2x8x326xf32, #tpu.memory_space<vmem>>, vector<1x4x16xf32>
    %198 = vector.shape_cast %197 : vector<1x4x16xf32> to vector<4x16xf32>
    %199 = vector.shape_cast %196 : vector<4x16xf32> to vector<1x4x16xf32>
    tpu.vector_store %arg5[%c1_143, %c0_144, %c73_145], %199 {strides = array<i32>} : memref<2x8x326xf32, #tpu.memory_space<vmem>>, vector<1x4x16xf32>,
    %200 = vector.extract_strided_slice %183 {offsets = [0, 64], sizes = [4, 16], strides = [1, 1]} : vector<4x256xf32> to vector<4x16xf32>
    %c1_146 = arith.constant 1 : index
    %c0_147 = arith.constant 0 : index
    %c91_148 = arith.constant 91 : index
    %201 = vector.load %arg5[%c1_146, %c0_147, %c91_148] : memref<2x8x326xf32, #tpu.memory_space<vmem>>, vector<1x4x16xf32>
    %202 = vector.shape_cast %201 : vector<1x4x16xf32> to vector<4x16xf32>
    %203 = vector.shape_cast %200 : vector<4x16xf32> to vector<1x4x16xf32>
    tpu.vector_store %arg5[%c1_146, %c0_147, %c91_148], %203 {strides = array<i32>} : memref<2x8x326xf32, #tpu.memory_space<vmem>>, vector<1x4x16xf32>,
    %204 = vector.extract_strided_slice %183 {offsets = [0, 80], sizes = [4, 16], strides = [1, 1]} : vector<4x256xf32> to vector<4x16xf32>
    %c1_149 = arith.constant 1 : index
    %c0_150 = arith.constant 0 : index
    %c109_151 = arith.constant 109 : index
    %205 = vector.load %arg5[%c1_149, %c0_150, %c109_151] : memref<2x8x326xf32, #tpu.memory_space<vmem>>, vector<1x4x16xf32>
    %206 = vector.shape_cast %205 : vector<1x4x16xf32> to vector<4x16xf32>
    %207 = vector.shape_cast %204 : vector<4x16xf32> to vector<1x4x16xf32>
    tpu.vector_store %arg5[%c1_149, %c0_150, %c109_151], %207 {strides = array<i32>} : memref<2x8x326xf32, #tpu.memory_space<vmem>>, vector<1x4x16xf32>,
    %208 = vector.extract_strided_slice %183 {offsets = [0, 96], sizes = [4, 16], strides = [1, 1]} : vector<4x256xf32> to vector<4x16xf32>
    %c1_152 = arith.constant 1 : index
    %c0_153 = arith.constant 0 : index
    %c127_154 = arith.constant 127 : index
    %209 = vector.load %arg5[%c1_152, %c0_153, %c127_154] : memref<2x8x326xf32, #tpu.memory_space<vmem>>, vector<1x4x16xf32>
    %210 = vector.shape_cast %209 : vector<1x4x16xf32> to vector<4x16xf32>
    %211 = vector.shape_cast %208 : vector<4x16xf32> to vector<1x4x16xf32>
    tpu.vector_store %arg5[%c1_152, %c0_153, %c127_154], %211 {strides = array<i32>} : memref<2x8x326xf32, #tpu.memory_space<vmem>>, vector<1x4x16xf32>,
    %212 = vector.extract_strided_slice %183 {offsets = [0, 112], sizes = [4, 16], strides = [1, 1]} : vector<4x256xf32> to vector<4x16xf32>
    %c1_155 = arith.constant 1 : index
    %c0_156 = arith.constant 0 : index
    %c145_157 = arith.constant 145 : index
    %213 = vector.load %arg5[%c1_155, %c0_156, %c145_157] : memref<2x8x326xf32, #tpu.memory_space<vmem>>, vector<1x4x16xf32>
    %214 = vector.shape_cast %213 : vector<1x4x16xf32> to vector<4x16xf32>
    %215 = vector.shape_cast %212 : vector<4x16xf32> to vector<1x4x16xf32>
    tpu.vector_store %arg5[%c1_155, %c0_156, %c145_157], %215 {strides = array<i32>} : memref<2x8x326xf32, #tpu.memory_space<vmem>>, vector<1x4x16xf32>,
    %216 = vector.extract_strided_slice %183 {offsets = [0, 128], sizes = [4, 16], strides = [1, 1]} : vector<4x256xf32> to vector<4x16xf32>
    %c1_158 = arith.constant 1 : index
    %c0_159 = arith.constant 0 : index
    %c163_160 = arith.constant 163 : index
    %217 = vector.load %arg5[%c1_158, %c0_159, %c163_160] : memref<2x8x326xf32, #tpu.memory_space<vmem>>, vector<1x4x16xf32>
    %218 = vector.shape_cast %217 : vector<1x4x16xf32> to vector<4x16xf32>
    %219 = vector.shape_cast %216 : vector<4x16xf32> to vector<1x4x16xf32>
    tpu.vector_store %arg5[%c1_158, %c0_159, %c163_160], %219 {strides = array<i32>} : memref<2x8x326xf32, #tpu.memory_space<vmem>>, vector<1x4x16xf32>,
    %220 = vector.extract_strided_slice %183 {offsets = [0, 144], sizes = [4, 16], strides = [1, 1]} : vector<4x256xf32> to vector<4x16xf32>
    %c1_161 = arith.constant 1 : index
    %c0_162 = arith.constant 0 : index
    %c181_163 = arith.constant 181 : index
    %221 = vector.load %arg5[%c1_161, %c0_162, %c181_163] : memref<2x8x326xf32, #tpu.memory_space<vmem>>, vector<1x4x16xf32>
    %222 = vector.shape_cast %221 : vector<1x4x16xf32> to vector<4x16xf32>
    %223 = vector.shape_cast %220 : vector<4x16xf32> to vector<1x4x16xf32>
    tpu.vector_store %arg5[%c1_161, %c0_162, %c181_163], %223 {strides = array<i32>} : memref<2x8x326xf32, #tpu.memory_space<vmem>>, vector<1x4x16xf32>,
    %224 = vector.extract_strided_slice %183 {offsets = [0, 160], sizes = [4, 16], strides = [1, 1]} : vector<4x256xf32> to vector<4x16xf32>
    %c1_164 = arith.constant 1 : index
    %c0_165 = arith.constant 0 : index
    %c199_166 = arith.constant 199 : index
    %225 = vector.load %arg5[%c1_164, %c0_165, %c199_166] : memref<2x8x326xf32, #tpu.memory_space<vmem>>, vector<1x4x16xf32>
    %226 = vector.shape_cast %225 : vector<1x4x16xf32> to vector<4x16xf32>
    %227 = vector.shape_cast %224 : vector<4x16xf32> to vector<1x4x16xf32>
    tpu.vector_store %arg5[%c1_164, %c0_165, %c199_166], %227 {strides = array<i32>} : memref<2x8x326xf32, #tpu.memory_space<vmem>>, vector<1x4x16xf32>,
    %228 = vector.extract_strided_slice %183 {offsets = [0, 176], sizes = [4, 16], strides = [1, 1]} : vector<4x256xf32> to vector<4x16xf32>
    %c1_167 = arith.constant 1 : index
    %c0_168 = arith.constant 0 : index
    %c217_169 = arith.constant 217 : index
    %229 = vector.load %arg5[%c1_167, %c0_168, %c217_169] : memref<2x8x326xf32, #tpu.memory_space<vmem>>, vector<1x4x16xf32>
    %230 = vector.shape_cast %229 : vector<1x4x16xf32> to vector<4x16xf32>
    %231 = vector.shape_cast %228 : vector<4x16xf32> to vector<1x4x16xf32>
    tpu.vector_store %arg5[%c1_167, %c0_168, %c217_169], %231 {strides = array<i32>} : memref<2x8x326xf32, #tpu.memory_space<vmem>>, vector<1x4x16xf32>,
    %232 = vector.extract_strided_slice %183 {offsets = [0, 192], sizes = [4, 16], strides = [1, 1]} : vector<4x256xf32> to vector<4x16xf32>
    %c1_170 = arith.constant 1 : index
    %c0_171 = arith.constant 0 : index
    %c235_172 = arith.constant 235 : index
    %233 = vector.load %arg5[%c1_170, %c0_171, %c235_172] : memref<2x8x326xf32, #tpu.memory_space<vmem>>, vector<1x4x16xf32>
    %234 = vector.shape_cast %233 : vector<1x4x16xf32> to vector<4x16xf32>
    %235 = vector.shape_cast %232 : vector<4x16xf32> to vector<1x4x16xf32>
    tpu.vector_store %arg5[%c1_170, %c0_171, %c235_172], %235 {strides = array<i32>} : memref<2x8x326xf32, #tpu.memory_space<vmem>>, vector<1x4x16xf32>,
    %236 = vector.extract_strided_slice %183 {offsets = [0, 208], sizes = [4, 16], strides = [1, 1]} : vector<4x256xf32> to vector<4x16xf32>
    %c1_173 = arith.constant 1 : index
    %c0_174 = arith.constant 0 : index
    %c253_175 = arith.constant 253 : index
    %237 = vector.load %arg5[%c1_173, %c0_174, %c253_175] : memref<2x8x326xf32, #tpu.memory_space<vmem>>, vector<1x4x16xf32>
    %238 = vector.shape_cast %237 : vector<1x4x16xf32> to vector<4x16xf32>
    %239 = vector.shape_cast %236 : vector<4x16xf32> to vector<1x4x16xf32>
    tpu.vector_store %arg5[%c1_173, %c0_174, %c253_175], %239 {strides = array<i32>} : memref<2x8x326xf32, #tpu.memory_space<vmem>>, vector<1x4x16xf32>,
    %240 = vector.extract_strided_slice %183 {offsets = [0, 224], sizes = [4, 16], strides = [1, 1]} : vector<4x256xf32> to vector<4x16xf32>
    %c1_176 = arith.constant 1 : index
    %c0_177 = arith.constant 0 : index
    %c271_178 = arith.constant 271 : index
    %241 = vector.load %arg5[%c1_176, %c0_177, %c271_178] : memref<2x8x326xf32, #tpu.memory_space<vmem>>, vector<1x4x16xf32>
    %242 = vector.shape_cast %241 : vector<1x4x16xf32> to vector<4x16xf32>
    %243 = vector.shape_cast %240 : vector<4x16xf32> to vector<1x4x16xf32>
    tpu.vector_store %arg5[%c1_176, %c0_177, %c271_178], %243 {strides = array<i32>} : memref<2x8x326xf32, #tpu.memory_space<vmem>>, vector<1x4x16xf32>,
    %244 = vector.extract_strided_slice %183 {offsets = [0, 240], sizes = [4, 16], strides = [1, 1]} : vector<4x256xf32> to vector<4x16xf32>
    %c1_179 = arith.constant 1 : index
    %c0_180 = arith.constant 0 : index
    %c289_181 = arith.constant 289 : index
    %245 = vector.load %arg5[%c1_179, %c0_180, %c289_181] : memref<2x8x326xf32, #tpu.memory_space<vmem>>, vector<1x4x16xf32>
    %246 = vector.shape_cast %245 : vector<1x4x16xf32> to vector<4x16xf32>
    %247 = vector.shape_cast %244 : vector<4x16xf32> to vector<1x4x16xf32>
    tpu.vector_store %arg5[%c1_179, %c0_180, %c289_181], %247 {strides = array<i32>} : memref<2x8x326xf32, #tpu.memory_space<vmem>>, vector<1x4x16xf32>,
    %c0_182 = arith.constant 0 : index
    %c0_183 = arith.constant 0 : index
    %c0_184 = arith.constant 0 : index
    %248 = vector.load %arg5[%c0_182, %c0_183, %c0_184] : memref<2x8x326xf32, #tpu.memory_space<vmem>>, vector<1x8x288xf32>
    %249 = vector.shape_cast %248 : vector<1x8x288xf32> to vector<8x288xf32>
    %c0_185 = arith.constant 0 : index
    %c0_186 = arith.constant 0 : index
    %250 = vector.load %arg6[%c0_185, %c0_186] : memref<72x576xf32, #tpu.memory_space<vmem>>, vector<8x288xf32>
    tpu.vector_store %arg6[%c0_185, %c0_186], %249 {strides = array<i32>} : memref<72x576xf32, #tpu.memory_space<vmem>>, vector<8x288xf32>,
    %c1_187 = arith.constant 1 : index
    %c0_188 = arith.constant 0 : index
    %c0_189 = arith.constant 0 : index
    %251 = vector.load %arg5[%c1_187, %c0_188, %c0_189] : memref<2x8x326xf32, #tpu.memory_space<vmem>>, vector<1x8x288xf32>
    %252 = vector.shape_cast %251 : vector<1x8x288xf32> to vector<8x288xf32>
    %c0_190 = arith.constant 0 : index
    %c288 = arith.constant 288 : index
    %253 = vector.load %arg6[%c0_190, %c288] : memref<72x576xf32, #tpu.memory_space<vmem>>, vector<8x288xf32>
    tpu.vector_store %arg6[%c0_190, %c288], %252 {strides = array<i32>} : memref<72x576xf32, #tpu.memory_space<vmem>>, vector<8x288xf32>,
    %c0_191 = arith.constant 0 : index
    %c0_192 = arith.constant 0 : index
    %c1_193 = arith.constant 1 : index
    %254 = vector.load %arg5[%c0_191, %c0_192, %c1_193] : memref<2x8x326xf32, #tpu.memory_space<vmem>>, vector<1x8x288xf32>
    %255 = vector.shape_cast %254 : vector<1x8x288xf32> to vector<8x288xf32>
    %c8 = arith.constant 8 : index
    %c0_194 = arith.constant 0 : index
    %256 = vector.load %arg6[%c8, %c0_194] : memref<72x576xf32, #tpu.memory_space<vmem>>, vector<8x288xf32>
    tpu.vector_store %arg6[%c8, %c0_194], %255 {strides = array<i32>} : memref<72x576xf32, #tpu.memory_space<vmem>>, vector<8x288xf32>,
    %c1_195 = arith.constant 1 : index
    %c0_196 = arith.constant 0 : index
    %c1_197 = arith.constant 1 : index
    %257 = vector.load %arg5[%c1_195, %c0_196, %c1_197] : memref<2x8x326xf32, #tpu.memory_space<vmem>>, vector<1x8x288xf32>
    %258 = vector.shape_cast %257 : vector<1x8x288xf32> to vector<8x288xf32>
    %c8_198 = arith.constant 8 : index
    %c288_199 = arith.constant 288 : index
    %259 = vector.load %arg6[%c8_198, %c288_199] : memref<72x576xf32, #tpu.memory_space<vmem>>, vector<8x288xf32>
    tpu.vector_store %arg6[%c8_198, %c288_199], %258 {strides = array<i32>} : memref<72x576xf32, #tpu.memory_space<vmem>>, vector<8x288xf32>,
    %c0_200 = arith.constant 0 : index
    %c0_201 = arith.constant 0 : index
    %c2 = arith.constant 2 : index
    %260 = vector.load %arg5[%c0_200, %c0_201, %c2] : memref<2x8x326xf32, #tpu.memory_space<vmem>>, vector<1x8x288xf32>
    %261 = vector.shape_cast %260 : vector<1x8x288xf32> to vector<8x288xf32>
    %c16 = arith.constant 16 : index
    %c0_202 = arith.constant 0 : index
    %262 = vector.load %arg6[%c16, %c0_202] : memref<72x576xf32, #tpu.memory_space<vmem>>, vector<8x288xf32>
    tpu.vector_store %arg6[%c16, %c0_202], %261 {strides = array<i32>} : memref<72x576xf32, #tpu.memory_space<vmem>>, vector<8x288xf32>,
    %c1_203 = arith.constant 1 : index
    %c0_204 = arith.constant 0 : index
    %c2_205 = arith.constant 2 : index
    %263 = vector.load %arg5[%c1_203, %c0_204, %c2_205] : memref<2x8x326xf32, #tpu.memory_space<vmem>>, vector<1x8x288xf32>
    %264 = vector.shape_cast %263 : vector<1x8x288xf32> to vector<8x288xf32>
    %c16_206 = arith.constant 16 : index
    %c288_207 = arith.constant 288 : index
    %265 = vector.load %arg6[%c16_206, %c288_207] : memref<72x576xf32, #tpu.memory_space<vmem>>, vector<8x288xf32>
    tpu.vector_store %arg6[%c16_206, %c288_207], %264 {strides = array<i32>} : memref<72x576xf32, #tpu.memory_space<vmem>>, vector<8x288xf32>,
    %c0_208 = arith.constant 0 : index
    %c0_209 = arith.constant 0 : index
    %c18 = arith.constant 18 : index
    %266 = vector.load %arg5[%c0_208, %c0_209, %c18] : memref<2x8x326xf32, #tpu.memory_space<vmem>>, vector<1x8x288xf32>
    %267 = vector.shape_cast %266 : vector<1x8x288xf32> to vector<8x288xf32>
    %c24 = arith.constant 24 : index
    %c0_210 = arith.constant 0 : index
    %268 = vector.load %arg6[%c24, %c0_210] : memref<72x576xf32, #tpu.memory_space<vmem>>, vector<8x288xf32>
    tpu.vector_store %arg6[%c24, %c0_210], %267 {strides = array<i32>} : memref<72x576xf32, #tpu.memory_space<vmem>>, vector<8x288xf32>,
    %c1_211 = arith.constant 1 : index
    %c0_212 = arith.constant 0 : index
    %c18_213 = arith.constant 18 : index
    %269 = vector.load %arg5[%c1_211, %c0_212, %c18_213] : memref<2x8x326xf32, #tpu.memory_space<vmem>>, vector<1x8x288xf32>
    %270 = vector.shape_cast %269 : vector<1x8x288xf32> to vector<8x288xf32>
    %c24_214 = arith.constant 24 : index
    %c288_215 = arith.constant 288 : index
    %271 = vector.load %arg6[%c24_214, %c288_215] : memref<72x576xf32, #tpu.memory_space<vmem>>, vector<8x288xf32>
    tpu.vector_store %arg6[%c24_214, %c288_215], %270 {strides = array<i32>} : memref<72x576xf32, #tpu.memory_space<vmem>>, vector<8x288xf32>,
    %c0_216 = arith.constant 0 : index
    %c0_217 = arith.constant 0 : index
    %c19_218 = arith.constant 19 : index
    %272 = vector.load %arg5[%c0_216, %c0_217, %c19_218] : memref<2x8x326xf32, #tpu.memory_space<vmem>>, vector<1x8x288xf32>
    %273 = vector.shape_cast %272 : vector<1x8x288xf32> to vector<8x288xf32>
    %c32 = arith.constant 32 : index
    %c0_219 = arith.constant 0 : index
    %274 = vector.load %arg6[%c32, %c0_219] : memref<72x576xf32, #tpu.memory_space<vmem>>, vector<8x288xf32>
    tpu.vector_store %arg6[%c32, %c0_219], %273 {strides = array<i32>} : memref<72x576xf32, #tpu.memory_space<vmem>>, vector<8x288xf32>,
    %c1_220 = arith.constant 1 : index
    %c0_221 = arith.constant 0 : index
    %c19_222 = arith.constant 19 : index
    %275 = vector.load %arg5[%c1_220, %c0_221, %c19_222] : memref<2x8x326xf32, #tpu.memory_space<vmem>>, vector<1x8x288xf32>
    %276 = vector.shape_cast %275 : vector<1x8x288xf32> to vector<8x288xf32>
    %c32_223 = arith.constant 32 : index
    %c288_224 = arith.constant 288 : index
    %277 = vector.load %arg6[%c32_223, %c288_224] : memref<72x576xf32, #tpu.memory_space<vmem>>, vector<8x288xf32>
    tpu.vector_store %arg6[%c32_223, %c288_224], %276 {strides = array<i32>} : memref<72x576xf32, #tpu.memory_space<vmem>>, vector<8x288xf32>,
    %c0_225 = arith.constant 0 : index
    %c0_226 = arith.constant 0 : index
    %c20 = arith.constant 20 : index
    %278 = vector.load %arg5[%c0_225, %c0_226, %c20] : memref<2x8x326xf32, #tpu.memory_space<vmem>>, vector<1x8x288xf32>
    %279 = vector.shape_cast %278 : vector<1x8x288xf32> to vector<8x288xf32>
    %c40 = arith.constant 40 : index
    %c0_227 = arith.constant 0 : index
    %280 = vector.load %arg6[%c40, %c0_227] : memref<72x576xf32, #tpu.memory_space<vmem>>, vector<8x288xf32>
    tpu.vector_store %arg6[%c40, %c0_227], %279 {strides = array<i32>} : memref<72x576xf32, #tpu.memory_space<vmem>>, vector<8x288xf32>,
    %c1_228 = arith.constant 1 : index
    %c0_229 = arith.constant 0 : index
    %c20_230 = arith.constant 20 : index
    %281 = vector.load %arg5[%c1_228, %c0_229, %c20_230] : memref<2x8x326xf32, #tpu.memory_space<vmem>>, vector<1x8x288xf32>
    %282 = vector.shape_cast %281 : vector<1x8x288xf32> to vector<8x288xf32>
    %c40_231 = arith.constant 40 : index
    %c288_232 = arith.constant 288 : index
    %283 = vector.load %arg6[%c40_231, %c288_232] : memref<72x576xf32, #tpu.memory_space<vmem>>, vector<8x288xf32>
    tpu.vector_store %arg6[%c40_231, %c288_232], %282 {strides = array<i32>} : memref<72x576xf32, #tpu.memory_space<vmem>>, vector<8x288xf32>,
    %c0_233 = arith.constant 0 : index
    %c0_234 = arith.constant 0 : index
    %c36 = arith.constant 36 : index
    %284 = vector.load %arg5[%c0_233, %c0_234, %c36] : memref<2x8x326xf32, #tpu.memory_space<vmem>>, vector<1x8x288xf32>
    %285 = vector.shape_cast %284 : vector<1x8x288xf32> to vector<8x288xf32>
    %c48 = arith.constant 48 : index
    %c0_235 = arith.constant 0 : index
    %286 = vector.load %arg6[%c48, %c0_235] : memref<72x576xf32, #tpu.memory_space<vmem>>, vector<8x288xf32>
    tpu.vector_store %arg6[%c48, %c0_235], %285 {strides = array<i32>} : memref<72x576xf32, #tpu.memory_space<vmem>>, vector<8x288xf32>,
    %c1_236 = arith.constant 1 : index
    %c0_237 = arith.constant 0 : index
    %c36_238 = arith.constant 36 : index
    %287 = vector.load %arg5[%c1_236, %c0_237, %c36_238] : memref<2x8x326xf32, #tpu.memory_space<vmem>>, vector<1x8x288xf32>
    %288 = vector.shape_cast %287 : vector<1x8x288xf32> to vector<8x288xf32>
    %c48_239 = arith.constant 48 : index
    %c288_240 = arith.constant 288 : index
    %289 = vector.load %arg6[%c48_239, %c288_240] : memref<72x576xf32, #tpu.memory_space<vmem>>, vector<8x288xf32>
    tpu.vector_store %arg6[%c48_239, %c288_240], %288 {strides = array<i32>} : memref<72x576xf32, #tpu.memory_space<vmem>>, vector<8x288xf32>,
    %c0_241 = arith.constant 0 : index
    %c0_242 = arith.constant 0 : index
    %c37_243 = arith.constant 37 : index
    %290 = vector.load %arg5[%c0_241, %c0_242, %c37_243] : memref<2x8x326xf32, #tpu.memory_space<vmem>>, vector<1x8x288xf32>
    %291 = vector.shape_cast %290 : vector<1x8x288xf32> to vector<8x288xf32>
    %c56 = arith.constant 56 : index
    %c0_244 = arith.constant 0 : index
    %292 = vector.load %arg6[%c56, %c0_244] : memref<72x576xf32, #tpu.memory_space<vmem>>, vector<8x288xf32>
    tpu.vector_store %arg6[%c56, %c0_244], %291 {strides = array<i32>} : memref<72x576xf32, #tpu.memory_space<vmem>>, vector<8x288xf32>,
    %c1_245 = arith.constant 1 : index
    %c0_246 = arith.constant 0 : index
    %c37_247 = arith.constant 37 : index
    %293 = vector.load %arg5[%c1_245, %c0_246, %c37_247] : memref<2x8x326xf32, #tpu.memory_space<vmem>>, vector<1x8x288xf32>
    %294 = vector.shape_cast %293 : vector<1x8x288xf32> to vector<8x288xf32>
    %c56_248 = arith.constant 56 : index
    %c288_249 = arith.constant 288 : index
    %295 = vector.load %arg6[%c56_248, %c288_249] : memref<72x576xf32, #tpu.memory_space<vmem>>, vector<8x288xf32>
    tpu.vector_store %arg6[%c56_248, %c288_249], %294 {strides = array<i32>} : memref<72x576xf32, #tpu.memory_space<vmem>>, vector<8x288xf32>,
    %c0_250 = arith.constant 0 : index
    %c0_251 = arith.constant 0 : index
    %c38 = arith.constant 38 : index
    %296 = vector.load %arg5[%c0_250, %c0_251, %c38] : memref<2x8x326xf32, #tpu.memory_space<vmem>>, vector<1x8x288xf32>
    %297 = vector.shape_cast %296 : vector<1x8x288xf32> to vector<8x288xf32>
    %c64 = arith.constant 64 : index
    %c0_252 = arith.constant 0 : index
    %298 = vector.load %arg6[%c64, %c0_252] : memref<72x576xf32, #tpu.memory_space<vmem>>, vector<8x288xf32>
    tpu.vector_store %arg6[%c64, %c0_252], %297 {strides = array<i32>} : memref<72x576xf32, #tpu.memory_space<vmem>>, vector<8x288xf32>,
    %c1_253 = arith.constant 1 : index
    %c0_254 = arith.constant 0 : index
    %c38_255 = arith.constant 38 : index
    %299 = vector.load %arg5[%c1_253, %c0_254, %c38_255] : memref<2x8x326xf32, #tpu.memory_space<vmem>>, vector<1x8x288xf32>
    %300 = vector.shape_cast %299 : vector<1x8x288xf32> to vector<8x288xf32>
    %c64_256 = arith.constant 64 : index
    %c288_257 = arith.constant 288 : index
    %301 = vector.load %arg6[%c64_256, %c288_257] : memref<72x576xf32, #tpu.memory_space<vmem>>, vector<8x288xf32>
    tpu.vector_store %arg6[%c64_256, %c288_257], %300 {strides = array<i32>} : memref<72x576xf32, #tpu.memory_space<vmem>>, vector<8x288xf32>,
    %c0_258 = arith.constant 0 : index
    %c0_259 = arith.constant 0 : index
    %302 = vector.load %arg2[%c0_258, %c0_259] : memref<8x72xf32, #tpu.memory_space<vmem>>, vector<8x72xf32>
    %c0_260 = arith.constant 0 : index
    %c0_261 = arith.constant 0 : index
    %303 = vector.load %arg6[%c0_260, %c0_261] : memref<72x576xf32, #tpu.memory_space<vmem>>, vector<72x576xf32>
    %cst_262 = arith.constant dense<0.000000e+00> : vector<8x576xf32>
    %304 = tpu.matmul %302, %303, %cst_262 {dimension_numbers = #tpu.dot_dimension_numbers<[1], [0], [0], [1], [0, 0, 1, 1], [], []>} : vector<8x72xf32>, vector<72x576xf32>, vector<8x576xf32> -> vector<8x576xf32>
    %c0_263 = arith.constant 0 : index
    %c0_264 = arith.constant 0 : index
    %305 = vector.load %arg3[%c0_263, %c0_264] : memref<8x1xf32, #tpu.memory_space<vmem>>, vector<8x1xf32>
    %306 = vector.broadcast %305 : vector<8x1xf32> to vector<8x576xf32>
    %307 = arith.addf %304, %306 : vector<8x576xf32>
    %308 = vector.extract_strided_slice %307 {offsets = [0, 0], sizes = [8, 288], strides = [1, 1]} : vector<8x576xf32> to vector<8x288xf32>
    %309 = vector.extract_strided_slice %308 {offsets = [0, 0], sizes = [8, 16], strides = [1, 1]} : vector<8x288xf32> to vector<8x16xf32>
    %c0_265 = arith.constant 0 : index
    %c0_266 = arith.constant 0 : index
    %c0_267 = arith.constant 0 : index
    %310 = vector.load %arg4[%c0_265, %c0_266, %c0_267] : memref<2x8x256xf32, #tpu.memory_space<vmem>>, vector<1x8x16xf32>
    %311 = vector.shape_cast %310 : vector<1x8x16xf32> to vector<8x16xf32>
    %312 = vector.shape_cast %309 : vector<8x16xf32> to vector<1x8x16xf32>
    tpu.vector_store %arg4[%c0_265, %c0_266, %c0_267], %312 {strides = array<i32>} : memref<2x8x256xf32, #tpu.memory_space<vmem>>, vector<1x8x16xf32>,
    %313 = vector.extract_strided_slice %308 {offsets = [0, 18], sizes = [8, 16], strides = [1, 1]} : vector<8x288xf32> to vector<8x16xf32>
    %c0_268 = arith.constant 0 : index
    %c0_269 = arith.constant 0 : index
    %c16_270 = arith.constant 16 : index
    %314 = vector.load %arg4[%c0_268, %c0_269, %c16_270] : memref<2x8x256xf32, #tpu.memory_space<vmem>>, vector<1x8x16xf32>
    %315 = vector.shape_cast %314 : vector<1x8x16xf32> to vector<8x16xf32>
    %316 = vector.shape_cast %313 : vector<8x16xf32> to vector<1x8x16xf32>
    tpu.vector_store %arg4[%c0_268, %c0_269, %c16_270], %316 {strides = array<i32>} : memref<2x8x256xf32, #tpu.memory_space<vmem>>, vector<1x8x16xf32>,
    %317 = vector.extract_strided_slice %308 {offsets = [0, 36], sizes = [8, 16], strides = [1, 1]} : vector<8x288xf32> to vector<8x16xf32>
    %c0_271 = arith.constant 0 : index
    %c0_272 = arith.constant 0 : index
    %c32_273 = arith.constant 32 : index
    %318 = vector.load %arg4[%c0_271, %c0_272, %c32_273] : memref<2x8x256xf32, #tpu.memory_space<vmem>>, vector<1x8x16xf32>
    %319 = vector.shape_cast %318 : vector<1x8x16xf32> to vector<8x16xf32>
    %320 = vector.shape_cast %317 : vector<8x16xf32> to vector<1x8x16xf32>
    tpu.vector_store %arg4[%c0_271, %c0_272, %c32_273], %320 {strides = array<i32>} : memref<2x8x256xf32, #tpu.memory_space<vmem>>, vector<1x8x16xf32>,
    %321 = vector.extract_strided_slice %308 {offsets = [0, 54], sizes = [8, 16], strides = [1, 1]} : vector<8x288xf32> to vector<8x16xf32>
    %c0_274 = arith.constant 0 : index
    %c0_275 = arith.constant 0 : index
    %c48_276 = arith.constant 48 : index
    %322 = vector.load %arg4[%c0_274, %c0_275, %c48_276] : memref<2x8x256xf32, #tpu.memory_space<vmem>>, vector<1x8x16xf32>
    %323 = vector.shape_cast %322 : vector<1x8x16xf32> to vector<8x16xf32>
    %324 = vector.shape_cast %321 : vector<8x16xf32> to vector<1x8x16xf32>
    tpu.vector_store %arg4[%c0_274, %c0_275, %c48_276], %324 {strides = array<i32>} : memref<2x8x256xf32, #tpu.memory_space<vmem>>, vector<1x8x16xf32>,
    %325 = vector.extract_strided_slice %308 {offsets = [0, 72], sizes = [8, 16], strides = [1, 1]} : vector<8x288xf32> to vector<8x16xf32>
    %c0_277 = arith.constant 0 : index
    %c0_278 = arith.constant 0 : index
    %c64_279 = arith.constant 64 : index
    %326 = vector.load %arg4[%c0_277, %c0_278, %c64_279] : memref<2x8x256xf32, #tpu.memory_space<vmem>>, vector<1x8x16xf32>
    %327 = vector.shape_cast %326 : vector<1x8x16xf32> to vector<8x16xf32>
    %328 = vector.shape_cast %325 : vector<8x16xf32> to vector<1x8x16xf32>
    tpu.vector_store %arg4[%c0_277, %c0_278, %c64_279], %328 {strides = array<i32>} : memref<2x8x256xf32, #tpu.memory_space<vmem>>, vector<1x8x16xf32>,
    %329 = vector.extract_strided_slice %308 {offsets = [0, 90], sizes = [8, 16], strides = [1, 1]} : vector<8x288xf32> to vector<8x16xf32>
    %c0_280 = arith.constant 0 : index
    %c0_281 = arith.constant 0 : index
    %c80 = arith.constant 80 : index
    %330 = vector.load %arg4[%c0_280, %c0_281, %c80] : memref<2x8x256xf32, #tpu.memory_space<vmem>>, vector<1x8x16xf32>
    %331 = vector.shape_cast %330 : vector<1x8x16xf32> to vector<8x16xf32>
    %332 = vector.shape_cast %329 : vector<8x16xf32> to vector<1x8x16xf32>
    tpu.vector_store %arg4[%c0_280, %c0_281, %c80], %332 {strides = array<i32>} : memref<2x8x256xf32, #tpu.memory_space<vmem>>, vector<1x8x16xf32>,
    %333 = vector.extract_strided_slice %308 {offsets = [0, 108], sizes = [8, 16], strides = [1, 1]} : vector<8x288xf32> to vector<8x16xf32>
    %c0_282 = arith.constant 0 : index
    %c0_283 = arith.constant 0 : index
    %c96 = arith.constant 96 : index
    %334 = vector.load %arg4[%c0_282, %c0_283, %c96] : memref<2x8x256xf32, #tpu.memory_space<vmem>>, vector<1x8x16xf32>
    %335 = vector.shape_cast %334 : vector<1x8x16xf32> to vector<8x16xf32>
    %336 = vector.shape_cast %333 : vector<8x16xf32> to vector<1x8x16xf32>
    tpu.vector_store %arg4[%c0_282, %c0_283, %c96], %336 {strides = array<i32>} : memref<2x8x256xf32, #tpu.memory_space<vmem>>, vector<1x8x16xf32>,
    %337 = vector.extract_strided_slice %308 {offsets = [0, 126], sizes = [8, 16], strides = [1, 1]} : vector<8x288xf32> to vector<8x16xf32>
    %c0_284 = arith.constant 0 : index
    %c0_285 = arith.constant 0 : index
    %c112 = arith.constant 112 : index
    %338 = vector.load %arg4[%c0_284, %c0_285, %c112] : memref<2x8x256xf32, #tpu.memory_space<vmem>>, vector<1x8x16xf32>
    %339 = vector.shape_cast %338 : vector<1x8x16xf32> to vector<8x16xf32>
    %340 = vector.shape_cast %337 : vector<8x16xf32> to vector<1x8x16xf32>
    tpu.vector_store %arg4[%c0_284, %c0_285, %c112], %340 {strides = array<i32>} : memref<2x8x256xf32, #tpu.memory_space<vmem>>, vector<1x8x16xf32>,
    %341 = vector.extract_strided_slice %308 {offsets = [0, 144], sizes = [8, 16], strides = [1, 1]} : vector<8x288xf32> to vector<8x16xf32>
    %c0_286 = arith.constant 0 : index
    %c0_287 = arith.constant 0 : index
    %c128 = arith.constant 128 : index
    %342 = vector.load %arg4[%c0_286, %c0_287, %c128] : memref<2x8x256xf32, #tpu.memory_space<vmem>>, vector<1x8x16xf32>
    %343 = vector.shape_cast %342 : vector<1x8x16xf32> to vector<8x16xf32>
    %344 = vector.shape_cast %341 : vector<8x16xf32> to vector<1x8x16xf32>
    tpu.vector_store %arg4[%c0_286, %c0_287, %c128], %344 {strides = array<i32>} : memref<2x8x256xf32, #tpu.memory_space<vmem>>, vector<1x8x16xf32>,
    %345 = vector.extract_strided_slice %308 {offsets = [0, 162], sizes = [8, 16], strides = [1, 1]} : vector<8x288xf32> to vector<8x16xf32>
    %c0_288 = arith.constant 0 : index
    %c0_289 = arith.constant 0 : index
    %c144 = arith.constant 144 : index
    %346 = vector.load %arg4[%c0_288, %c0_289, %c144] : memref<2x8x256xf32, #tpu.memory_space<vmem>>, vector<1x8x16xf32>
    %347 = vector.shape_cast %346 : vector<1x8x16xf32> to vector<8x16xf32>
    %348 = vector.shape_cast %345 : vector<8x16xf32> to vector<1x8x16xf32>
    tpu.vector_store %arg4[%c0_288, %c0_289, %c144], %348 {strides = array<i32>} : memref<2x8x256xf32, #tpu.memory_space<vmem>>, vector<1x8x16xf32>,
    %349 = vector.extract_strided_slice %308 {offsets = [0, 180], sizes = [8, 16], strides = [1, 1]} : vector<8x288xf32> to vector<8x16xf32>
    %c0_290 = arith.constant 0 : index
    %c0_291 = arith.constant 0 : index
    %c160 = arith.constant 160 : index
    %350 = vector.load %arg4[%c0_290, %c0_291, %c160] : memref<2x8x256xf32, #tpu.memory_space<vmem>>, vector<1x8x16xf32>
    %351 = vector.shape_cast %350 : vector<1x8x16xf32> to vector<8x16xf32>
    %352 = vector.shape_cast %349 : vector<8x16xf32> to vector<1x8x16xf32>
    tpu.vector_store %arg4[%c0_290, %c0_291, %c160], %352 {strides = array<i32>} : memref<2x8x256xf32, #tpu.memory_space<vmem>>, vector<1x8x16xf32>,
    %353 = vector.extract_strided_slice %308 {offsets = [0, 198], sizes = [8, 16], strides = [1, 1]} : vector<8x288xf32> to vector<8x16xf32>
    %c0_292 = arith.constant 0 : index
    %c0_293 = arith.constant 0 : index
    %c176 = arith.constant 176 : index
    %354 = vector.load %arg4[%c0_292, %c0_293, %c176] : memref<2x8x256xf32, #tpu.memory_space<vmem>>, vector<1x8x16xf32>
    %355 = vector.shape_cast %354 : vector<1x8x16xf32> to vector<8x16xf32>
    %356 = vector.shape_cast %353 : vector<8x16xf32> to vector<1x8x16xf32>
    tpu.vector_store %arg4[%c0_292, %c0_293, %c176], %356 {strides = array<i32>} : memref<2x8x256xf32, #tpu.memory_space<vmem>>, vector<1x8x16xf32>,
    %357 = vector.extract_strided_slice %308 {offsets = [0, 216], sizes = [8, 16], strides = [1, 1]} : vector<8x288xf32> to vector<8x16xf32>
    %c0_294 = arith.constant 0 : index
    %c0_295 = arith.constant 0 : index
    %c192 = arith.constant 192 : index
    %358 = vector.load %arg4[%c0_294, %c0_295, %c192] : memref<2x8x256xf32, #tpu.memory_space<vmem>>, vector<1x8x16xf32>
    %359 = vector.shape_cast %358 : vector<1x8x16xf32> to vector<8x16xf32>
    %360 = vector.shape_cast %357 : vector<8x16xf32> to vector<1x8x16xf32>
    tpu.vector_store %arg4[%c0_294, %c0_295, %c192], %360 {strides = array<i32>} : memref<2x8x256xf32, #tpu.memory_space<vmem>>, vector<1x8x16xf32>,
    %361 = vector.extract_strided_slice %308 {offsets = [0, 234], sizes = [8, 16], strides = [1, 1]} : vector<8x288xf32> to vector<8x16xf32>
    %c0_296 = arith.constant 0 : index
    %c0_297 = arith.constant 0 : index
    %c208 = arith.constant 208 : index
    %362 = vector.load %arg4[%c0_296, %c0_297, %c208] : memref<2x8x256xf32, #tpu.memory_space<vmem>>, vector<1x8x16xf32>
    %363 = vector.shape_cast %362 : vector<1x8x16xf32> to vector<8x16xf32>
    %364 = vector.shape_cast %361 : vector<8x16xf32> to vector<1x8x16xf32>
    tpu.vector_store %arg4[%c0_296, %c0_297, %c208], %364 {strides = array<i32>} : memref<2x8x256xf32, #tpu.memory_space<vmem>>, vector<1x8x16xf32>,
    %365 = vector.extract_strided_slice %308 {offsets = [0, 252], sizes = [8, 16], strides = [1, 1]} : vector<8x288xf32> to vector<8x16xf32>
    %c0_298 = arith.constant 0 : index
    %c0_299 = arith.constant 0 : index
    %c224 = arith.constant 224 : index
    %366 = vector.load %arg4[%c0_298, %c0_299, %c224] : memref<2x8x256xf32, #tpu.memory_space<vmem>>, vector<1x8x16xf32>
    %367 = vector.shape_cast %366 : vector<1x8x16xf32> to vector<8x16xf32>
    %368 = vector.shape_cast %365 : vector<8x16xf32> to vector<1x8x16xf32>
    tpu.vector_store %arg4[%c0_298, %c0_299, %c224], %368 {strides = array<i32>} : memref<2x8x256xf32, #tpu.memory_space<vmem>>, vector<1x8x16xf32>,
    %369 = vector.extract_strided_slice %308 {offsets = [0, 270], sizes = [8, 16], strides = [1, 1]} : vector<8x288xf32> to vector<8x16xf32>
    %c0_300 = arith.constant 0 : index
    %c0_301 = arith.constant 0 : index
    %c240 = arith.constant 240 : index
    %370 = vector.load %arg4[%c0_300, %c0_301, %c240] : memref<2x8x256xf32, #tpu.memory_space<vmem>>, vector<1x8x16xf32>
    %371 = vector.shape_cast %370 : vector<1x8x16xf32> to vector<8x16xf32>
    %372 = vector.shape_cast %369 : vector<8x16xf32> to vector<1x8x16xf32>
    tpu.vector_store %arg4[%c0_300, %c0_301, %c240], %372 {strides = array<i32>} : memref<2x8x256xf32, #tpu.memory_space<vmem>>, vector<1x8x16xf32>,
    %373 = vector.extract_strided_slice %307 {offsets = [0, 288], sizes = [8, 288], strides = [1, 1]} : vector<8x576xf32> to vector<8x288xf32>
    %374 = vector.extract_strided_slice %373 {offsets = [0, 0], sizes = [8, 16], strides = [1, 1]} : vector<8x288xf32> to vector<8x16xf32>
    %c1_302 = arith.constant 1 : index
    %c0_303 = arith.constant 0 : index
    %c0_304 = arith.constant 0 : index
    %375 = vector.load %arg4[%c1_302, %c0_303, %c0_304] : memref<2x8x256xf32, #tpu.memory_space<vmem>>, vector<1x8x16xf32>
    %376 = vector.shape_cast %375 : vector<1x8x16xf32> to vector<8x16xf32>
    %377 = vector.shape_cast %374 : vector<8x16xf32> to vector<1x8x16xf32>
    tpu.vector_store %arg4[%c1_302, %c0_303, %c0_304], %377 {strides = array<i32>} : memref<2x8x256xf32, #tpu.memory_space<vmem>>, vector<1x8x16xf32>,
    %378 = vector.extract_strided_slice %373 {offsets = [0, 18], sizes = [8, 16], strides = [1, 1]} : vector<8x288xf32> to vector<8x16xf32>
    %c1_305 = arith.constant 1 : index
    %c0_306 = arith.constant 0 : index
    %c16_307 = arith.constant 16 : index
    %379 = vector.load %arg4[%c1_305, %c0_306, %c16_307] : memref<2x8x256xf32, #tpu.memory_space<vmem>>, vector<1x8x16xf32>
    %380 = vector.shape_cast %379 : vector<1x8x16xf32> to vector<8x16xf32>
    %381 = vector.shape_cast %378 : vector<8x16xf32> to vector<1x8x16xf32>
    tpu.vector_store %arg4[%c1_305, %c0_306, %c16_307], %381 {strides = array<i32>} : memref<2x8x256xf32, #tpu.memory_space<vmem>>, vector<1x8x16xf32>,
    %382 = vector.extract_strided_slice %373 {offsets = [0, 36], sizes = [8, 16], strides = [1, 1]} : vector<8x288xf32> to vector<8x16xf32>
    %c1_308 = arith.constant 1 : index
    %c0_309 = arith.constant 0 : index
    %c32_310 = arith.constant 32 : index
    %383 = vector.load %arg4[%c1_308, %c0_309, %c32_310] : memref<2x8x256xf32, #tpu.memory_space<vmem>>, vector<1x8x16xf32>
    %384 = vector.shape_cast %383 : vector<1x8x16xf32> to vector<8x16xf32>
    %385 = vector.shape_cast %382 : vector<8x16xf32> to vector<1x8x16xf32>
    tpu.vector_store %arg4[%c1_308, %c0_309, %c32_310], %385 {strides = array<i32>} : memref<2x8x256xf32, #tpu.memory_space<vmem>>, vector<1x8x16xf32>,
    %386 = vector.extract_strided_slice %373 {offsets = [0, 54], sizes = [8, 16], strides = [1, 1]} : vector<8x288xf32> to vector<8x16xf32>
    %c1_311 = arith.constant 1 : index
    %c0_312 = arith.constant 0 : index
    %c48_313 = arith.constant 48 : index
    %387 = vector.load %arg4[%c1_311, %c0_312, %c48_313] : memref<2x8x256xf32, #tpu.memory_space<vmem>>, vector<1x8x16xf32>
    %388 = vector.shape_cast %387 : vector<1x8x16xf32> to vector<8x16xf32>
    %389 = vector.shape_cast %386 : vector<8x16xf32> to vector<1x8x16xf32>
    tpu.vector_store %arg4[%c1_311, %c0_312, %c48_313], %389 {strides = array<i32>} : memref<2x8x256xf32, #tpu.memory_space<vmem>>, vector<1x8x16xf32>,
    %390 = vector.extract_strided_slice %373 {offsets = [0, 72], sizes = [8, 16], strides = [1, 1]} : vector<8x288xf32> to vector<8x16xf32>
    %c1_314 = arith.constant 1 : index
    %c0_315 = arith.constant 0 : index
    %c64_316 = arith.constant 64 : index
    %391 = vector.load %arg4[%c1_314, %c0_315, %c64_316] : memref<2x8x256xf32, #tpu.memory_space<vmem>>, vector<1x8x16xf32>
    %392 = vector.shape_cast %391 : vector<1x8x16xf32> to vector<8x16xf32>
    %393 = vector.shape_cast %390 : vector<8x16xf32> to vector<1x8x16xf32>
    tpu.vector_store %arg4[%c1_314, %c0_315, %c64_316], %393 {strides = array<i32>} : memref<2x8x256xf32, #tpu.memory_space<vmem>>, vector<1x8x16xf32>,
    %394 = vector.extract_strided_slice %373 {offsets = [0, 90], sizes = [8, 16], strides = [1, 1]} : vector<8x288xf32> to vector<8x16xf32>
    %c1_317 = arith.constant 1 : index
    %c0_318 = arith.constant 0 : index
    %c80_319 = arith.constant 80 : index
    %395 = vector.load %arg4[%c1_317, %c0_318, %c80_319] : memref<2x8x256xf32, #tpu.memory_space<vmem>>, vector<1x8x16xf32>
    %396 = vector.shape_cast %395 : vector<1x8x16xf32> to vector<8x16xf32>
    %397 = vector.shape_cast %394 : vector<8x16xf32> to vector<1x8x16xf32>
    tpu.vector_store %arg4[%c1_317, %c0_318, %c80_319], %397 {strides = array<i32>} : memref<2x8x256xf32, #tpu.memory_space<vmem>>, vector<1x8x16xf32>,
    %398 = vector.extract_strided_slice %373 {offsets = [0, 108], sizes = [8, 16], strides = [1, 1]} : vector<8x288xf32> to vector<8x16xf32>
    %c1_320 = arith.constant 1 : index
    %c0_321 = arith.constant 0 : index
    %c96_322 = arith.constant 96 : index
    %399 = vector.load %arg4[%c1_320, %c0_321, %c96_322] : memref<2x8x256xf32, #tpu.memory_space<vmem>>, vector<1x8x16xf32>
    %400 = vector.shape_cast %399 : vector<1x8x16xf32> to vector<8x16xf32>
    %401 = vector.shape_cast %398 : vector<8x16xf32> to vector<1x8x16xf32>
    tpu.vector_store %arg4[%c1_320, %c0_321, %c96_322], %401 {strides = array<i32>} : memref<2x8x256xf32, #tpu.memory_space<vmem>>, vector<1x8x16xf32>,
    %402 = vector.extract_strided_slice %373 {offsets = [0, 126], sizes = [8, 16], strides = [1, 1]} : vector<8x288xf32> to vector<8x16xf32>
    %c1_323 = arith.constant 1 : index
    %c0_324 = arith.constant 0 : index
    %c112_325 = arith.constant 112 : index
    %403 = vector.load %arg4[%c1_323, %c0_324, %c112_325] : memref<2x8x256xf32, #tpu.memory_space<vmem>>, vector<1x8x16xf32>
    %404 = vector.shape_cast %403 : vector<1x8x16xf32> to vector<8x16xf32>
    %405 = vector.shape_cast %402 : vector<8x16xf32> to vector<1x8x16xf32>
    tpu.vector_store %arg4[%c1_323, %c0_324, %c112_325], %405 {strides = array<i32>} : memref<2x8x256xf32, #tpu.memory_space<vmem>>, vector<1x8x16xf32>,
    %406 = vector.extract_strided_slice %373 {offsets = [0, 144], sizes = [8, 16], strides = [1, 1]} : vector<8x288xf32> to vector<8x16xf32>
    %c1_326 = arith.constant 1 : index
    %c0_327 = arith.constant 0 : index
    %c128_328 = arith.constant 128 : index
    %407 = vector.load %arg4[%c1_326, %c0_327, %c128_328] : memref<2x8x256xf32, #tpu.memory_space<vmem>>, vector<1x8x16xf32>
    %408 = vector.shape_cast %407 : vector<1x8x16xf32> to vector<8x16xf32>
    %409 = vector.shape_cast %406 : vector<8x16xf32> to vector<1x8x16xf32>
    tpu.vector_store %arg4[%c1_326, %c0_327, %c128_328], %409 {strides = array<i32>} : memref<2x8x256xf32, #tpu.memory_space<vmem>>, vector<1x8x16xf32>,
    %410 = vector.extract_strided_slice %373 {offsets = [0, 162], sizes = [8, 16], strides = [1, 1]} : vector<8x288xf32> to vector<8x16xf32>
    %c1_329 = arith.constant 1 : index
    %c0_330 = arith.constant 0 : index
    %c144_331 = arith.constant 144 : index
    %411 = vector.load %arg4[%c1_329, %c0_330, %c144_331] : memref<2x8x256xf32, #tpu.memory_space<vmem>>, vector<1x8x16xf32>
    %412 = vector.shape_cast %411 : vector<1x8x16xf32> to vector<8x16xf32>
    %413 = vector.shape_cast %410 : vector<8x16xf32> to vector<1x8x16xf32>
    tpu.vector_store %arg4[%c1_329, %c0_330, %c144_331], %413 {strides = array<i32>} : memref<2x8x256xf32, #tpu.memory_space<vmem>>, vector<1x8x16xf32>,
    %414 = vector.extract_strided_slice %373 {offsets = [0, 180], sizes = [8, 16], strides = [1, 1]} : vector<8x288xf32> to vector<8x16xf32>
    %c1_332 = arith.constant 1 : index
    %c0_333 = arith.constant 0 : index
    %c160_334 = arith.constant 160 : index
    %415 = vector.load %arg4[%c1_332, %c0_333, %c160_334] : memref<2x8x256xf32, #tpu.memory_space<vmem>>, vector<1x8x16xf32>
    %416 = vector.shape_cast %415 : vector<1x8x16xf32> to vector<8x16xf32>
    %417 = vector.shape_cast %414 : vector<8x16xf32> to vector<1x8x16xf32>
    tpu.vector_store %arg4[%c1_332, %c0_333, %c160_334], %417 {strides = array<i32>} : memref<2x8x256xf32, #tpu.memory_space<vmem>>, vector<1x8x16xf32>,
    %418 = vector.extract_strided_slice %373 {offsets = [0, 198], sizes = [8, 16], strides = [1, 1]} : vector<8x288xf32> to vector<8x16xf32>
    %c1_335 = arith.constant 1 : index
    %c0_336 = arith.constant 0 : index
    %c176_337 = arith.constant 176 : index
    %419 = vector.load %arg4[%c1_335, %c0_336, %c176_337] : memref<2x8x256xf32, #tpu.memory_space<vmem>>, vector<1x8x16xf32>
    %420 = vector.shape_cast %419 : vector<1x8x16xf32> to vector<8x16xf32>
    %421 = vector.shape_cast %418 : vector<8x16xf32> to vector<1x8x16xf32>
    tpu.vector_store %arg4[%c1_335, %c0_336, %c176_337], %421 {strides = array<i32>} : memref<2x8x256xf32, #tpu.memory_space<vmem>>, vector<1x8x16xf32>,
    %422 = vector.extract_strided_slice %373 {offsets = [0, 216], sizes = [8, 16], strides = [1, 1]} : vector<8x288xf32> to vector<8x16xf32>
    %c1_338 = arith.constant 1 : index
    %c0_339 = arith.constant 0 : index
    %c192_340 = arith.constant 192 : index
    %423 = vector.load %arg4[%c1_338, %c0_339, %c192_340] : memref<2x8x256xf32, #tpu.memory_space<vmem>>, vector<1x8x16xf32>
    %424 = vector.shape_cast %423 : vector<1x8x16xf32> to vector<8x16xf32>
    %425 = vector.shape_cast %422 : vector<8x16xf32> to vector<1x8x16xf32>
    tpu.vector_store %arg4[%c1_338, %c0_339, %c192_340], %425 {strides = array<i32>} : memref<2x8x256xf32, #tpu.memory_space<vmem>>, vector<1x8x16xf32>,
    %426 = vector.extract_strided_slice %373 {offsets = [0, 234], sizes = [8, 16], strides = [1, 1]} : vector<8x288xf32> to vector<8x16xf32>
    %c1_341 = arith.constant 1 : index
    %c0_342 = arith.constant 0 : index
    %c208_343 = arith.constant 208 : index
    %427 = vector.load %arg4[%c1_341, %c0_342, %c208_343] : memref<2x8x256xf32, #tpu.memory_space<vmem>>, vector<1x8x16xf32>
    %428 = vector.shape_cast %427 : vector<1x8x16xf32> to vector<8x16xf32>
    %429 = vector.shape_cast %426 : vector<8x16xf32> to vector<1x8x16xf32>
    tpu.vector_store %arg4[%c1_341, %c0_342, %c208_343], %429 {strides = array<i32>} : memref<2x8x256xf32, #tpu.memory_space<vmem>>, vector<1x8x16xf32>,
    %430 = vector.extract_strided_slice %373 {offsets = [0, 252], sizes = [8, 16], strides = [1, 1]} : vector<8x288xf32> to vector<8x16xf32>
    %c1_344 = arith.constant 1 : index
    %c0_345 = arith.constant 0 : index
    %c224_346 = arith.constant 224 : index
    %431 = vector.load %arg4[%c1_344, %c0_345, %c224_346] : memref<2x8x256xf32, #tpu.memory_space<vmem>>, vector<1x8x16xf32>
    %432 = vector.shape_cast %431 : vector<1x8x16xf32> to vector<8x16xf32>
    %433 = vector.shape_cast %430 : vector<8x16xf32> to vector<1x8x16xf32>
    tpu.vector_store %arg4[%c1_344, %c0_345, %c224_346], %433 {strides = array<i32>} : memref<2x8x256xf32, #tpu.memory_space<vmem>>, vector<1x8x16xf32>,
    %434 = vector.extract_strided_slice %373 {offsets = [0, 270], sizes = [8, 16], strides = [1, 1]} : vector<8x288xf32> to vector<8x16xf32>
    %c1_347 = arith.constant 1 : index
    %c0_348 = arith.constant 0 : index
    %c240_349 = arith.constant 240 : index
    %435 = vector.load %arg4[%c1_347, %c0_348, %c240_349] : memref<2x8x256xf32, #tpu.memory_space<vmem>>, vector<1x8x16xf32>
    %436 = vector.shape_cast %435 : vector<1x8x16xf32> to vector<8x16xf32>
    %437 = vector.shape_cast %434 : vector<8x16xf32> to vector<1x8x16xf32>
    tpu.vector_store %arg4[%c1_347, %c0_348, %c240_349], %437 {strides = array<i32>} : memref<2x8x256xf32, #tpu.memory_space<vmem>>, vector<1x8x16xf32>,
    return
  }
  func.func @transform_0(%arg0: i32) -> (i32, i32, i32) {
    %c0_i32 = arith.constant 0 : i32
    %c0_i32_0 = arith.constant 0 : i32
    %c0_i32_1 = arith.constant 0 : i32
    return %arg0, %c0_i32, %c0_i32_0 : i32, i32, i32
  }
  func.func @transform_1(%arg0: i32) -> (i32, i32) {
    %c0_i32 = arith.constant 0 : i32
    %c0_i32_0 = arith.constant 0 : i32
    %c0_i32_1 = arith.constant 0 : i32
    return %c0_i32, %c0_i32_0 : i32, i32
  }
  func.func @transform_2(%arg0: i32) -> (i32, i32) {
    %c0_i32 = arith.constant 0 : i32
    %c0_i32_0 = arith.constant 0 : i32
    %c0_i32_1 = arith.constant 0 : i32
    return %c0_i32, %c0_i32_0 : i32, i32
  }
  func.func @transform_3(%arg0: i32) -> (i32, i32, i32) {
    %c0_i32 = arith.constant 0 : i32
    %c0_i32_0 = arith.constant 0 : i32
    %c0_i32_1 = arith.constant 0 : i32
    return %arg0, %c0_i32, %c0_i32_0 : i32, i32, i32
  }
}

</mosaic_0001>

<bundles_post_ra>
// kernel: _lambda_.1
= control target key start
LH: loop header
LB: loop body
LE: loop exit
PB: predicated region body
PF: predicated region fallthrough
CT: control target
= control target key end

     0   :  { %s1222_s14 = smov 80   ;;  %s1223_s15 = smov 112   ;;  %vm34_vm0 = vcmask 134264   ;;  %vm36_vm1 = vcmask 281864   ;;  %vm38_vm2 = vcmask 429464   ;;  %v1229_v2 = vmov 0.0   ;;  %s1788_s0 = inlined_call_operand.vmem [shape: f32[2,4,256], index: 0, kind: input, shape index: {}]   ;;  %s1789_s2 = inlined_call_operand.vmem [shape: f32[8,1], index: 2, kind: input, shape index: {}]   ;;  %s1790_s1 = inlined_call_operand.vmem [shape: f32[8,72], index: 1, kind: input, shape index: {}]   ;;  %s1791_s3 = inlined_call_operand.vmem [shape: f32[2,8,256], index: 3, kind: output, shape index: {}]  }
   0x1   :  { %v1307_v0 = vld [vmem:[%s1788_s0] sm:$0xff]  ;;  %s1224_s16 = smov 48   ;;  %s1225_s17 = smov 96   ;;  %v1323_v1 = vld [vmem:[%s1788_s0 + $0x8] sm:$0xff]  ;;  %35 = vst.msk [vmem:[#allocation2 + $0x8] sm:$0xf] %vm34_vm0, %v1229_v2  ;;  %757 = vmatprep.mubr.f32.mxu0 %v1229_v2  ;;  %828 = vmatprep.mubr.f32.mxu1 %v1229_v2 }
   0x2   :  { %118 = vrot.lane.b32.xlu1 %v1307_v0, %s1222_s14  ;;  %102 = vrot.lane.b32.xlu0 %v1307_v0, %s1223_s15  ;;  %s1226_s18 = smov 32   ;;  %s1227_s19 = smov 64   ;;  %vm40_vm3 = vcmask 577064   ;;  %14 = vst [vmem:[#allocation2] sm:$0xf0] %v1229_v2  ;;  %vm42_vm4 = vcmask 724664  }
   0x3   :  { %s1228_s22 = smov 16   ;;  %15 = vst [vmem:[#allocation2 + $0x8] sm:$0xf0] %v1229_v2  ;;  %161 = vst [vmem:[#allocation2 + $0x18] sm:$0xf0] %v1229_v2  ;;  %vm18_vm5 = vcmask 150528  }
   0x4   :  { %162 = vst [vmem:[#allocation2 + $0x20] sm:$0xf0] %v1229_v2  ;;  %172 = vst.msk [vmem:[#allocation2 + $0x20] sm:$0xf] %vm34_vm0, %v1229_v2  ;;  %vm22_vm6 = vcmask 298264   ;;  %vm24_vm7 = vcmask 445864  }
   0x5   :  { %37 = vst.msk [vmem:[#allocation2 + $0x8] sm:$0xf] %vm36_vm1, %v1229_v2  ;;  %173 = vst.msk [vmem:[#allocation2 + $0x20] sm:$0xf] %vm36_vm1, %v1229_v2  ;;  %vm44_vm8 = vcmask 872264   ;;  %vm26_vm9 = vcmask 593464  }
   0x6   :  { %134 = vrot.lane.b32.xlu1 %v1307_v0, %s1224_s16  ;;  %110 = vrot.lane.b32.xlu0 %v1307_v0, %s1225_s17  ;;  %39 = vst.msk [vmem:[#allocation2 + $0x8] sm:$0xf] %vm38_vm2, %v1229_v2  ;;  %174 = vst.msk [vmem:[#allocation2 + $0x20] sm:$0xf] %vm38_vm2, %v1229_v2  ;;  %vm46_vm10 = vcmask 1019864   ;;  %vm28_vm11 = vcmask 741064  }
   0x7   :  { %19 = vst.msk [vmem:[#allocation2] sm:$0xf] %vm18_vm5, %v1229_v2  ;;  %164 = vst.msk [vmem:[#allocation2 + $0x18] sm:$0xf] %vm18_vm5, %v1229_v2  ;;  %vm30_vm12 = vcmask 888664   ;;  %vm32_vm13 = vcmask 1036264  }
   0x8   :  { %41 = vst.msk [vmem:[#allocation2 + $0x8] sm:$0xf] %vm40_vm3, %v1229_v2  ;;  %175 = vst.msk [vmem:[#allocation2 + $0x20] sm:$0xf] %vm40_vm3, %v1229_v2  ;;  %s1230_s0 = smov 33   ;;  %s1231_s23 = smov 31  }
   0x9   :  { %23 = vst.msk [vmem:[#allocation2] sm:$0xf] %vm22_vm6, %v1229_v2  ;;  %166 = vst.msk [vmem:[#allocation2 + $0x18] sm:$0xf] %vm22_vm6, %v1229_v2  ;;  %v96_v3 = vrot.slane %v1307_v0, 4  ;;  %s1232_s24 = smov 19  }
   0xa   :  { %144 = vrot.lane.b32.xlu1 %v1307_v0, %s1226_s18  ;;  %126 = vrot.lane.b32.xlu0 %v1307_v0, %s1227_s19  ;;  %43 = vst.msk [vmem:[#allocation2 + $0x8] sm:$0xf] %vm42_vm4, %v1229_v2  ;;  %176 = vst.msk [vmem:[#allocation2 + $0x20] sm:$0xf] %vm42_vm4, %v1229_v2  ;;  %s1233_s25 = smov 35   ;;  %s1234_s26 = smov 21  }
   0xb   :  { %25 = vst.msk [vmem:[#allocation2] sm:$0xf] %vm24_vm7, %v1229_v2  ;;  %167 = vst.msk [vmem:[#allocation2 + $0x18] sm:$0xf] %vm24_vm7, %v1229_v2  ;;  %s1235_s27 = smov 27   ;;  %s1236_s28 = smov 23  }
   0xc   :  { %45 = vst.msk [vmem:[#allocation2 + $0x8] sm:$0xf] %vm44_vm8, %v1229_v2  ;;  %177 = vst.msk [vmem:[#allocation2 + $0x20] sm:$0xf] %vm44_vm8, %v1229_v2  ;;  %s1237_s29 = smov 25   ;;  %s1238_s30 = smov 29  }
   0xd   :  { %27 = vst.msk [vmem:[#allocation2] sm:$0xf] %vm26_vm9, %v1229_v2  ;;  %168 = vst.msk [vmem:[#allocation2 + $0x18] sm:$0xf] %vm26_vm9, %v1229_v2  ;;  %v217_v4 = vrot.slane %v1323_v1, 4  ;;  %vm20_vm14 = vcmask 568712  }
   0xe   :  { %222 = vrot.lane.b32.xlu1 %v1323_v1, %s1223_s15  ;;  %152 = vrot.lane.b32.xlu0 %v1307_v0, %s1228_s22  ;;  %47 = vst.msk [vmem:[#allocation2 + $0x8] sm:$0xf] %vm46_vm10, %v1229_v2  ;;  %178 = vst.msk [vmem:[#allocation2 + $0x20] sm:$0xf] %vm46_vm10, %v1229_v2  ;;  %vm48_vm15 = vcmask 117864   ;;  %vm50_vm0 = vcmask 265464  }
   0xf   :  { %29 = vst.msk [vmem:[#allocation2] sm:$0xf] %vm28_vm11, %v1229_v2  ;;  %169 = vst.msk [vmem:[#allocation2 + $0x18] sm:$0xf] %vm28_vm11, %v1229_v2  ;;  %s1239_s4 = smov 53   ;;  %vm16_vm1 = vcmask 572420  }
  0x10   :  { %31 = vst.msk [vmem:[#allocation2] sm:$0xf] %vm30_vm12, %v1229_v2  ;;  %170 = vst.msk [vmem:[#allocation2 + $0x18] sm:$0xf] %vm30_vm12, %v1229_v2  ;;  %s1240_s5 = smov 125   ;;  %s1241_s6 = smov 71  }
  0x11   :  { %33 = vst.msk [vmem:[#allocation2] sm:$0xf] %vm32_vm13, %v1229_v2  ;;  %171 = vst.msk [vmem:[#allocation2 + $0x18] sm:$0xf] %vm32_vm13, %v1229_v2  ;;  %s1242_s7 = smov 107   ;;  %s1243_s8 = smov 89  }
  0x12   :  { %229 = vrot.lane.b32.xlu0 %v1323_v1, %s1225_s17  ;;  %236 = vrot.lane.b32.xlu1 %v1323_v1, %s1222_s14  ;;  %21 = vst.msk [vmem:[#allocation2 + $0x10] sm:$0xf] %vm20_vm14, %v1229_v2  ;;  %165 = vst.msk [vmem:[#allocation2 + $0x28] sm:$0xf] %vm20_vm14, %v1229_v2  ;;  %s1244_s9 = smov 15   ;;  %vm89_vm2 = vcmask 117760  }
  0x13   :  { %49 = vst.msk [vmem:[#allocation2 + $0x10] sm:$0xf] %vm48_vm15, %v1229_v2  ;;  %179 = vst.msk [vmem:[#allocation2 + $0x28] sm:$0xf] %vm48_vm15, %v1229_v2  ;;  %vm94_vm3 = vcmask 265352   ;;  %vm57_vm4 = vcmask 281752  }
  0x14   :  { %51 = vst.msk [vmem:[#allocation2 + $0x10] sm:$0xf] %vm50_vm0, %v1229_v2  ;;  %180 = vst.msk [vmem:[#allocation2 + $0x28] sm:$0xf] %vm50_vm0, %v1229_v2  ;;  %vm100_vm5 = vcmask 412952   ;;  %vm62_vm6 = vcmask 429352  }
  0x15   :  { %17 = vst.msk [vmem:[#allocation2 + $0x10] sm:$0xf0] %vm16_vm1, %v1229_v2  ;;  %163 = vst.msk [vmem:[#allocation2 + $0x28] sm:$0xf0] %vm16_vm1, %v1229_v2  ;;  %vm67_vm7 = vcmask 576952   ;;  %vm72_vm8 = vcmask 724552  }
  0x16   :  { %243 = vrot.lane.b32.xlu0 %v1323_v1, %s1227_s19  ;;  %250 = vrot.lane.b32.xlu1 %v1323_v1, %s1224_s16  ;;  %vm77_vm9 = vcmask 872152   ;;  %vm82_vm10 = vcmask 1019752   ;;  %vm87_vm11 = vcmask 1044472   ;;  %s1245_s10 = smov 126   ;;  %s1246_s11 = smov 127   ;;  %vm108_vm12 = vcmask 560552  }
  0x17   :  { %s1247_s12 = smov 109   ;;  %s1248_s13 = smov 110   ;;  %vm142_vm13 = vcmask 101376   ;;  %vm116_vm14 = vcmask 708152   ;;  %vm124_vm15 = vcmask 855752   ;;  %vm132_vm0 = vcmask 1003352  }
  0x18   :  { %s1249_s16 = smov 92   ;;  %s1250_s19 = smov 108   ;;  %vm140_vm1 = vcmask 1044456  }
  0x19   :  { %s1251_s20 = smov 91   ;;  %s1252_s21 = smov 13  }
  0x1a   :  { %258 = vrot.lane.b32.xlu0 %v1323_v1, %s1226_s18  ;;  %265 = vrot.lane.b32.xlu1 %v1323_v1, %s1228_s22  ;;  %s1253_s22 = smov 30  }
  0x1e   :  { %91 = vrot.lane.b32.xlu1 %v1307_v0, %s1230_s0  ;;  %84 = vrot.lane.b32.xlu0 %v1307_v0, %s1231_s23 }
  0x22   :  { %54 = vrot.lane.b32.xlu0 %v1307_v0, %s1232_s24  ;;  %97 = vrot.lane.b32.xlu1 %v96_v3, %s1233_s25 }
  0x26   :  { %59 = vrot.lane.b32.xlu0 %v1307_v0, %s1234_s26  ;;  %74 = vrot.lane.b32.xlu1 %v1307_v0, %s1235_s27 }
  0x2a   :  { %64 = vrot.lane.b32.xlu0 %v1307_v0, %s1236_s28  ;;  %184 = vrot.lane.b32.xlu1 %v1323_v1, %s1232_s24  ;;  %s1255_s24 = smov 14  }
  0x2e   :  { %69 = vrot.lane.b32.xlu0 %v1307_v0, %s1237_s29  ;;  %188 = vrot.lane.b32.xlu1 %v1323_v1, %s1234_s26  ;;  %s1257_s26 = smov 124  }
  0x32   :  { %79 = vrot.lane.b32.xlu0 %v1307_v0, %s1238_s30  ;;  %192 = vrot.lane.b32.xlu1 %v1323_v1, %s1236_s28 }
  0x36   :  { %196 = vrot.lane.b32.xlu1 %v1323_v1, %s1237_s29  ;;  %208 = vrot.lane.b32.xlu0 %v1323_v1, %s1231_s23 }
  0x3a   :  { %200 = vrot.lane.b32.xlu1 %v1323_v1, %s1235_s27  ;;  %213 = vrot.lane.b32.xlu0 %v1323_v1, %s1230_s0  ;;  %s1258_s27 = smov 123  }
  0x3e   :  { %204 = vrot.lane.b32.xlu1 %v1323_v1, %s1238_s30  ;;  %218 = vrot.lane.b32.xlu0 %v217_v4, %s1233_s25  ;;  %s1256_s25 = smov 90  }
  0x74   :  { %v119_v5 = vpop.permute.xlu1 %118  ;;  %v103_v6 = vpop.permute.xlu0 %102 }
  0x75   :  { %v104_v7 = vrot.slane %v103_v6, 4  ;;  %v120_v14 = vrot.slane %v119_v5, 4 }
  0x77   :  { %105 = vrot.lane.b32.xlu1 %v104_v7, %s1239_s4 }
  0x78   :  { %v135_v8 = vpop.permute.xlu1 %134  ;;  %v111_v9 = vpop.permute.xlu0 %110 }
  0x79   :  { %v136_v10 = vrot.slane %v135_v8, 4  ;;  %v112_v11 = vrot.slane %v111_v9, 4 }
  0x7b   :  { %137 = vrot.lane.b32.xlu0 %v136_v10, %s1240_s5  ;;  %113 = vrot.lane.b32.xlu1 %v112_v11, %s1241_s6 }
  0x7c   :  { %v145_v12 = vpop.permute.xlu1 %144  ;;  %v127_v13 = vpop.permute.xlu0 %126 }
  0x7d   :  { %v128_v15 = vrot.slane %v127_v13, 4  ;;  %v146_v18 = vrot.slane %v145_v12, 4  ;;  %v1260_v12 = vmov 0   ;;  %v683_v13 = vld [vmem:[%s1789_s2] sm:$0xff] }
  0x7e   :  { %1220 = vset.pattern.permute.xlu1 %v1260_v12  ;;  %1221 = vset.pattern.permute.xlu0 %v1260_v12 }
  0x7f   :  { %129 = vrot.lane.b32.xlu0 %v128_v15, %s1242_s7  ;;  %121 = vrot.lane.b32.xlu1 %v120_v14, %s1243_s8 }
  0x80   :  { %v223_v16 = vpop.permute.xlu1 %222  ;;  %v153_v17 = vpop.permute.xlu0 %152 }
  0x81   :  { %v224_v19 = vrot.slane %v223_v16, 4  ;;  %v154_v22 = vrot.slane %v153_v17, 4 }
  0x83   :  { %225 = vrot.lane.b32.xlu0 %v224_v19, %s1239_s4  ;;  %147 = vrot.lane.b32.xlu1 %v146_v18, %s1244_s9  ;;  %s1263_s4 = smov 94  }
  0x84   :  { %v230_v20 = vpop.permute.xlu0 %229  ;;  %v237_v21 = vpop.permute.xlu1 %236 }
  0x85   :  { %v231_v23 = vrot.slane %v230_v20, 4  ;;  %v238_v24 = vrot.slane %v237_v21, 4 }
  0x87   :  { %232 = vrot.lane.b32.xlu0 %v231_v23, %s1241_s6  ;;  %155 = vrot.lane.b32.xlu1 %v154_v22, %s1230_s0  ;;  %s1265_s6 = smov 86  }
  0x88   :  { %v244_v25 = vpop.permute.xlu0 %243  ;;  %v251_v26 = vpop.permute.xlu1 %250 }
  0x89   :  { %v252_v27 = vrot.slane %v251_v26, 4  ;;  %v245_v28 = vrot.slane %v244_v25, 4 }
  0x8b   :  { %239 = vrot.lane.b32.xlu0 %v238_v24, %s1243_s8  ;;  %253 = vrot.lane.b32.xlu1 %v252_v27, %s1240_s5  ;;  %s1264_s5 = smov 120   ;;  %s1267_s8 = smov 118  }
  0x8c   :  { %v259_v29 = vpop.permute.xlu0 %258  ;;  %v266_v30 = vpop.permute.xlu1 %265 }
  0x8d   :  { %v267_v31 = vrot.slane %v266_v30, 4  ;;  %v260_v32 = vrot.slane %v259_v29, 4 }
  0x8f   :  { %246 = vrot.lane.b32.xlu0 %v245_v28, %s1242_s7  ;;  %268 = vrot.lane.b32.xlu1 %v267_v31, %s1230_s0  ;;  %s1254_s0 = smov 12   ;;  %s1266_s7 = smov 88  }
  0x90   :  { %v92_v33 = vpop.permute.xlu1 %91  ;;  %v85_v34 = vpop.permute.xlu0 %84 }
  0x91   :  { %90 = vst.msk [vmem:[#allocation2 + $0x8] sm:$0xf] %vm89_vm2, %v85_v34 }
  0x92   :  { %95 = vst.msk [vmem:[#allocation2 + $0x8] sm:$0xf] %vm94_vm3, %v92_v33 }
  0x93   :  { %261 = vrot.lane.b32.xlu0 %v260_v32, %s1244_s9  ;;  %s1268_s9 = smov 100  }
  0x94   :  { %v55_v35 = vpop.permute.xlu0 %54  ;;  %v98_v36 = vpop.permute.xlu1 %97 }
  0x95   :  { %58 = vst.msk [vmem:[#allocation2] sm:$0xf] %vm57_vm4, %v55_v35 }
  0x96   :  { %101 = vst.msk [vmem:[#allocation2 + $0x8] sm:$0xf] %vm100_vm5, %v98_v36 }
  0x98   :  { %v60_v37 = vpop.permute.xlu0 %59  ;;  %v75_v38 = vpop.permute.xlu1 %74 }
  0x99   :  { %63 = vst.msk [vmem:[#allocation2] sm:$0xf] %vm62_vm6, %v60_v37 }
  0x9c   :  { %v65_v39 = vpop.permute.xlu0 %64  ;;  %v185_v40 = vpop.permute.xlu1 %184 }
  0x9d   :  { %68 = vst.msk [vmem:[#allocation2] sm:$0xf] %vm67_vm7, %v65_v39 }
  0x9e   :  { %187 = vst.msk [vmem:[#allocation2 + $0x18] sm:$0xf] %vm57_vm4, %v185_v40  ;;  %vm277_vm4 = vcmask 261120  }
  0xa0   :  { %v70_v41 = vpop.permute.xlu0 %69  ;;  %v189_v42 = vpop.permute.xlu1 %188 }
  0xa1   :  { %73 = vst.msk [vmem:[#allocation2] sm:$0xf] %vm72_vm8, %v70_v41 }
  0xa2   :  { %191 = vst.msk [vmem:[#allocation2 + $0x18] sm:$0xf] %vm62_vm6, %v189_v42  ;;  %vm299_vm6 = vcmask 523264  }
  0xa3   :  { %78 = vst.msk [vmem:[#allocation2] sm:$0xf] %vm77_vm9, %v75_v38 }
  0xa4   :  { %v80_v43 = vpop.permute.xlu0 %79  ;;  %v193_v44 = vpop.permute.xlu1 %192 }
  0xa5   :  { %83 = vst.msk [vmem:[#allocation2] sm:$0xf] %vm82_vm10, %v80_v43 }
  0xa6   :  { %195 = vst.msk [vmem:[#allocation2 + $0x18] sm:$0xf] %vm67_vm7, %v193_v44  ;;  %vm355_vm7 = vcmask 1031168  }
  0xa7   :  { %88 = vst.msk [vmem:[#allocation2] sm:$0xf] %vm87_vm11, %v85_v34 }
  0xa8   :  { %v197_v45 = vpop.permute.xlu1 %196  ;;  %v209_v46 = vpop.permute.xlu0 %208 }
  0xa9   :  { %199 = vst.msk [vmem:[#allocation2 + $0x18] sm:$0xf] %vm72_vm8, %v197_v45  ;;  %vm397_vm8 = vcmask 900096  }
  0xaa   :  { %212 = vst.msk [vmem:[#allocation2 + $0x20] sm:$0xf] %vm89_vm2, %v209_v46  ;;  %vm150_vm2 = vcmask 248952  }
  0xac   :  { %v201_v47 = vpop.permute.xlu1 %200  ;;  %v214_v48 = vpop.permute.xlu0 %213 }
  0xad   :  { %203 = vst.msk [vmem:[#allocation2 + $0x18] sm:$0xf] %vm77_vm9, %v201_v47  ;;  %vm439_vm9 = vcmask 891904  }
  0xae   :  { %v1440_v49 = vld [vmem:[#allocation2] sm:$0xff]  ;;  %216 = vst.msk [vmem:[#allocation2 + $0x20] sm:$0xf] %vm94_vm3, %v214_v48  ;;  %vm158_vm3 = vcmask 396552  }
  0xaf   :  { %349 = vrot.lane.b32.xlu1 %v1440_v49, %s1245_s10  ;;  %307 = vrot.lane.b32.xlu0 %v1440_v49, %s1246_s11 }
  0xb0   :  { %v205_v50 = vpop.permute.xlu1 %204  ;;  %v219_v51 = vpop.permute.xlu0 %218 }
  0xb1   :  { %207 = vst.msk [vmem:[#allocation2 + $0x18] sm:$0xf] %vm82_vm10, %v205_v50  ;;  %vm313_vm10 = vcmask 1039360  }
  0xb2   :  { %221 = vst.msk [vmem:[#allocation2 + $0x20] sm:$0xf] %vm100_vm5, %v219_v51  ;;  %vm296_vm5 = vcmask 1047808  }
  0xb3   :  { %211 = vst.msk [vmem:[#allocation2 + $0x18] sm:$0xf] %vm87_vm11, %v209_v46  ;;  %433 = vrot.lane.b32.xlu1 %v1440_v49, %s1247_s12  ;;  %391 = vrot.lane.b32.xlu0 %v1440_v49, %s1248_s13  ;;  %vm481_vm11 = vcmask 883712  }
  0xb7   :  { %517 = vrot.lane.b32.xlu1 %v1440_v49, %s1249_s16  ;;  %475 = vrot.lane.b32.xlu0 %v1440_v49, %s1250_s19 }
  0xba   :  { %v1458_v52 = vld [vmem:[#allocation2 + $0x18] sm:$0xff] }
  0xbb   :  { %285 = vrot.lane.b32.xlu1 %v1458_v52, %s1226_s18  ;;  %559 = vrot.lane.b32.xlu0 %v1440_v49, %s1251_s20 }
  0xbf   :  { %328 = vrot.lane.b32.xlu1 %v1458_v52, %s1231_s23  ;;  %454 = vrot.lane.b32.xlu0 %v1458_v52, %s1252_s21 }
  0xc3   :  { %370 = vrot.lane.b32.xlu1 %v1458_v52, %s1253_s22  ;;  %496 = vrot.lane.b32.xlu0 %v1458_v52, %s1254_s0 }
  0xc7   :  { %412 = vrot.lane.b32.xlu1 %v1458_v52, %s1255_s24 }
  0xcb   :  { %601 = vrot.lane.b32.xlu1 %v1440_v49, %s1256_s25 }
  0xe9   :  { %v106_v53 = vpop.permute.xlu1 %105 }
  0xea   :  { %109 = vst.msk [vmem:[#allocation2 + $0x8] sm:$0xf] %vm108_vm12, %v106_v53 }
  0xed   :  { %v138_v54 = vpop.permute.xlu0 %137  ;;  %v114_v55 = vpop.permute.xlu1 %113 }
  0xee   :  { %143 = vst.msk [vmem:[#allocation2 + $0x10] sm:$0xf] %vm142_vm13, %v138_v54 }
  0xef   :  { %117 = vst.msk [vmem:[#allocation2 + $0x8] sm:$0xf] %vm116_vm14, %v114_v55 }
  0xf1   :  { %v130_v56 = vpop.permute.xlu0 %129  ;;  %v122_v57 = vpop.permute.xlu1 %121 }
  0xf2   :  { %125 = vst.msk [vmem:[#allocation2 + $0x8] sm:$0xf] %vm124_vm15, %v122_v57 }
  0xf3   :  { %133 = vst.msk [vmem:[#allocation2 + $0x8] sm:$0xf] %vm132_vm0, %v130_v56 }
  0xf4   :  { %141 = vst.msk [vmem:[#allocation2 + $0x8] sm:$0xf] %vm140_vm1, %v138_v54 }
  0xf5   :  { %v226_v58 = vpop.permute.xlu0 %225  ;;  %v148_v59 = vpop.permute.xlu1 %147 }
  0xf6   :  { %228 = vst.msk [vmem:[#allocation2 + $0x20] sm:$0xf] %vm108_vm12, %v226_v58  ;;  %vm523_vm12 = vcmask 752640  }
  0xf7   :  { %151 = vst.msk [vmem:[#allocation2 + $0x10] sm:$0xf] %vm150_vm2, %v148_v59 }
  0xf9   :  { %v233_v60 = vpop.permute.xlu0 %232  ;;  %v156_v61 = vpop.permute.xlu1 %155 }
  0xfa   :  { %235 = vst.msk [vmem:[#allocation2 + $0x20] sm:$0xf] %vm116_vm14, %v233_v60  ;;  %vm565_vm14 = vcmask 744448  }
  0xfb   :  { %159 = vst.msk [vmem:[#allocation2 + $0x10] sm:$0xf] %vm158_vm3, %v156_v61  ;;  %v1486_v62 = vld [vmem:[#allocation2 + $0x8] sm:$0xff] }
  0xfd   :  { %v240_v63 = vpop.permute.xlu0 %239  ;;  %v254_v0 = vpop.permute.xlu1 %253 }
  0xfe   :  { %242 = vst.msk [vmem:[#allocation2 + $0x20] sm:$0xf] %vm124_vm15, %v240_v63  ;;  %vm376_vm15 = vcmask 244736  }
  0xff   :  { %257 = vst.msk [vmem:[#allocation2 + $0x28] sm:$0xf] %vm142_vm13, %v254_v0  ;;  %vm334_vm13 = vcmask 252928  }
 0x101   :  { %v247_v1 = vpop.permute.xlu0 %246  ;;  %v269_v4 = vpop.permute.xlu1 %268 }
 0x102   :  { %v345_v3 = vld [vmem:[#allocation2 + $0x10] sm:$0xff]  ;;  %249 = vst.msk [vmem:[#allocation2 + $0x20] sm:$0xf] %vm132_vm0, %v247_v1  ;;  %vm607_vm0 = vcmask 736256  }
 0x103   :  { %353 = vrot.lane.b32.xlu0 %v345_v3, %s1245_s10  ;;  %311 = vrot.lane.b32.xlu1 %v345_v3, %s1246_s11  ;;  %278 = vst.msk [vmem:[#allocation3 + $0x10] sm:$0xff] %vm277_vm4, %v345_v3 }
 0x104   :  { %256 = vst.msk [vmem:[#allocation2 + $0x20] sm:$0xf] %vm140_vm1, %v254_v0  ;;  %vm418_vm1 = vcmask 113664  }
 0x105   :  { %v262_v5 = vpop.permute.xlu0 %261 }
 0x106   :  { %264 = vst.msk [vmem:[#allocation2 + $0x28] sm:$0xf] %vm150_vm2, %v262_v5  ;;  %vm460_vm2 = vcmask 105472  }
 0x107   :  { %395 = vrot.lane.b32.xlu0 %v345_v3, %s1248_s13  ;;  %271 = vst.msk [vmem:[#allocation2 + $0x28] sm:$0xf] %vm158_vm3, %v269_v4  ;;  %vm502_vm3 = vcmask 97280  }
 0x10b   :  { %437 = vrot.lane.b32.xlu0 %v345_v3, %s1247_s12  ;;  %v280_v11 = vld [vmem:[#allocation2 + $0x20] sm:$0xff] }
 0x10e   :  { %v281_v6 = vld [vmem:[#allocation2 + $0x28] sm:$0xff] }
 0x10f   :  { %479 = vrot.lane.b32.xlu0 %v345_v3, %s1250_s19  ;;  %289 = vrot.lane.b32.xlu1 %v281_v6, %s1226_s18 }
 0x113   :  { %521 = vrot.lane.b32.xlu0 %v345_v3, %s1249_s16  ;;  %416 = vrot.lane.b32.xlu1 %v281_v6, %s1255_s24 }
 0x117   :  { %563 = vrot.lane.b32.xlu0 %v345_v3, %s1251_s20  ;;  %542 = vrot.lane.b32.xlu1 %v281_v6, %s1257_s26 }
 0x11b   :  { %605 = vrot.lane.b32.xlu0 %v345_v3, %s1256_s25  ;;  %584 = vrot.lane.b32.xlu1 %v281_v6, %s1258_s27 }
 0x11f   :  { %332 = vrot.lane.b32.xlu0 %v281_v6, %s1231_s23  ;;  %351 = vrot.lane.b32.xlu1 %v1486_v62, %s1245_s10 }
 0x121   :  { %v1509_v7 = vpop.permute.xlu1 %349  ;;  %v308_v14 = vpop.permute.xlu0 %307 }
 0x123   :  { %374 = vrot.lane.b32.xlu0 %v281_v6, %s1253_s22  ;;  %393 = vrot.lane.b32.xlu1 %v1486_v62, %s1248_s13 }
 0x125   :  { %v1514_v8 = vpop.permute.xlu1 %433  ;;  %v392_v15 = vpop.permute.xlu0 %391 }
 0x127   :  { %458 = vrot.lane.b32.xlu0 %v281_v6, %s1252_s21  ;;  %435 = vrot.lane.b32.xlu1 %v1486_v62, %s1247_s12  ;;  %s1272_s12 = smov 78  }
 0x129   :  { %v1519_v9 = vpop.permute.xlu1 %517  ;;  %v476_v17 = vpop.permute.xlu0 %475 }
 0x12b   :  { %309 = vrot.lane.b32.xlu0 %v1486_v62, %s1246_s11  ;;  %477 = vrot.lane.b32.xlu1 %v1486_v62, %s1250_s19  ;;  %s1270_s11 = smov 116  }
 0x12d   :  { %v1525_v10 = vpop.permute.xlu1 %285  ;;  %v1557_v19 = vpop.permute.xlu0 %559 }
 0x12e   :  { %297 = vst.msk [vmem:[#allocation3 + $0x10] sm:$0xff] %vm296_vm5, %v1525_v10 }
 0x12f   :  { %287 = vrot.lane.b32.xlu0 %v280_v11, %s1226_s18  ;;  %519 = vrot.lane.b32.xlu1 %v1486_v62, %s1249_s16  ;;  %s1259_s18 = smov 122  }
 0x131   :  { %v1553_v16 = vpop.permute.xlu1 %328  ;;  %v1561_v21 = vpop.permute.xlu0 %454 }
 0x133   :  { %330 = vrot.lane.b32.xlu0 %v280_v11, %s1231_s23  ;;  %561 = vrot.lane.b32.xlu1 %v1486_v62, %s1251_s20  ;;  %s1274_s20 = smov 76  }
 0x135   :  { %v1555_v18 = vpop.permute.xlu1 %370  ;;  %v1565_v23 = vpop.permute.xlu0 %496 }
 0x137   :  { %372 = vrot.lane.b32.xlu0 %v280_v11, %s1253_s22  ;;  %603 = vrot.lane.b32.xlu1 %v1486_v62, %s1256_s25  ;;  %s1276_s22 = smov 72  }
 0x139   :  { %v1559_v20 = vpop.permute.xlu1 %412 }
 0x13b   :  { %414 = vrot.lane.b32.xlu0 %v280_v11, %s1255_s24  ;;  %456 = vrot.lane.b32.xlu1 %v280_v11, %s1252_s21  ;;  %s1275_s21 = smov 74   ;;  %s1282_s24 = smov 82  }
 0x13d   :  { %v1563_v22 = vpop.permute.xlu1 %601 }
 0x13f   :  { %538 = vrot.lane.b32.xlu0 %v1458_v52, %s1257_s26  ;;  %498 = vrot.lane.b32.xlu1 %v280_v11, %s1254_s0 }
 0x143   :  { %540 = vrot.lane.b32.xlu0 %v280_v11, %s1257_s26  ;;  %500 = vrot.lane.b32.xlu1 %v281_v6, %s1254_s0  ;;  %s1277_s0 = smov 104  }
 0x147   :  { %582 = vrot.lane.b32.xlu0 %v280_v11, %s1258_s27  ;;  %580 = vrot.lane.b32.xlu1 %v1458_v52, %s1258_s27 }
 0x14b   :  { %624 = vrot.lane.b32.xlu0 %v280_v11, %s1259_s18  ;;  %626 = vrot.lane.b32.xlu1 %v281_v6, %s1259_s18 }
 0x14f   :  { %622 = vrot.lane.b32.xlu0 %v1458_v52, %s1259_s18  ;;  %686 = vperm.xlu1 %1220, %v683_v13  }
 0x175   :  { %v354_v24 = vpop.permute.xlu0 %353  ;;  %v312_v25 = vpop.permute.xlu1 %311 }
 0x176   :  { %363 = vst.msk [vmem:[#allocation3 + $0x60] sm:$0xff] %vm277_vm4, %v354_v24  ;;  %321 = vst.msk [vmem:[#allocation3 + $0x38] sm:$0xff] %vm277_vm4, %v312_v25 }
 0x177   :  { %382 = vst.msk [vmem:[#allocation3 + $0x60] sm:$0xff] %vm296_vm5, %v1555_v18  ;;  %340 = vst.msk [vmem:[#allocation3 + $0x38] sm:$0xff] %vm296_vm5, %v1553_v16 }
 0x179   :  { %v396_v26 = vpop.permute.xlu0 %395 }
 0x17a   :  { %405 = vst.msk [vmem:[#allocation3 + $0x88] sm:$0xff] %vm277_vm4, %v396_v26 }
 0x17b   :  { %424 = vst.msk [vmem:[#allocation3 + $0x88] sm:$0xff] %vm296_vm5, %v1559_v20 }
 0x17d   :  { %v438_v27 = vpop.permute.xlu0 %437 }
 0x17e   :  { %447 = vst.msk [vmem:[#allocation3 + $0xb0] sm:$0xff] %vm277_vm4, %v438_v27  ;;  %v645_v3 = vld [vmem:[#allocation3 + $0x38] sm:$0xff] }
 0x17f   :  { %466 = vst.msk [vmem:[#allocation3 + $0xb0] sm:$0xff] %vm296_vm5, %v1561_v21 }
 0x181   :  { %v480_v28 = vpop.permute.xlu0 %479  ;;  %v290_v29 = vpop.permute.xlu1 %289 }
 0x182   :  { %489 = vst.msk [vmem:[#allocation3 + $0xd8] sm:$0xff] %vm277_vm4, %v480_v28 }
 0x183   :  { %508 = vst.msk [vmem:[#allocation3 + $0xd8] sm:$0xff] %vm296_vm5, %v1565_v23 }
 0x185   :  { %v522_v30 = vpop.permute.xlu0 %521  ;;  %v1583_v31 = vpop.permute.xlu1 %416 }
 0x186   :  { %531 = vst.msk [vmem:[#allocation3 + $0x100] sm:$0xff] %vm277_vm4, %v522_v30 }
 0x189   :  { %v564_v32 = vpop.permute.xlu0 %563  ;;  %v1586_v33 = vpop.permute.xlu1 %542 }
 0x18a   :  { %573 = vst.msk [vmem:[#allocation3 + $0x128] sm:$0xff] %vm277_vm4, %v564_v32 }
 0x18b   :  { %552 = vst.msk [vmem:[#allocation3 + $0x110] sm:$0xff] %vm299_vm6, %v1586_v33 }
 0x18d   :  { %v1590_v34 = vpop.permute.xlu0 %605  ;;  %v1594_v35 = vpop.permute.xlu1 %584 }
 0x18e   :  { %615 = vst.msk [vmem:[#allocation3 + $0x150] sm:$0xff] %vm277_vm4, %v1590_v34 }
 0x18f   :  { %594 = vst.msk [vmem:[#allocation3 + $0x138] sm:$0xff] %vm299_vm6, %v1594_v35 }
 0x191   :  { %v333_v36 = vpop.permute.xlu0 %332  ;;  %v352_v37 = vpop.permute.xlu1 %351 }
 0x192   :  { %v356_v38 = vsel %vm355_vm7, %v1509_v7, %v352_v37  ;;  %v357_v39 = vsel %vm355_vm7, %v352_v37, %v354_v24  ;;  %vm544_vm7 = vcmask 1014784  }
 0x195   :  { %v375_v40 = vpop.permute.xlu0 %374  ;;  %v394_v41 = vpop.permute.xlu1 %393 }
 0x196   :  { %v398_v42 = vsel %vm397_vm8, %v392_v15, %v394_v41  ;;  %v399_v43 = vsel %vm397_vm8, %v394_v41, %v396_v26  ;;  %vm1262_vm8 = vmmov 0  }
 0x197   :  { %v1118_v58 = vpack.c.bf16 %v399_v43, %v357_v39 }
 0x199   :  { %v1599_v44 = vpop.permute.xlu0 %458  ;;  %v436_v45 = vpop.permute.xlu1 %435 }
 0x19a   :  { %v440_v46 = vsel %vm439_vm9, %v1514_v8, %v436_v45  ;;  %v441_v47 = vsel %vm439_vm9, %v436_v45, %v438_v27  ;;  %v655_v27 = vld [vmem:[#allocation3 + $0x88] sm:$0xff]  ;;  %vm586_vm9 = vcmask 1006592  }
 0x19d   :  { %v310_v48 = vpop.permute.xlu0 %309  ;;  %v478_v52 = vpop.permute.xlu1 %477 }
 0x19e   :  { %v314_v50 = vsel %vm313_vm10, %v308_v14, %v310_v48  ;;  %v315_v51 = vsel %vm313_vm10, %v310_v48, %v312_v25  ;;  %v482_v53 = vsel %vm481_vm11, %v476_v17, %v478_v52  ;;  %v483_v54 = vsel %vm481_vm11, %v478_v52, %v480_v28 }
 0x19f   :  { %v1114_v55 = vpack.c.bf16 %v315_v51, %v1486_v62  ;;  %v1116_v56 = vpack.c.bf16 %v314_v50, %v1440_v49  ;;  %v1120_v49 = vpack.c.bf16 %v398_v42, %v356_v38  ;;  %v1122_v1 = vpack.c.bf16 %v483_v54, %v441_v47 }
 0x1a0   :  { %v1124_v11 = vpack.c.bf16 %v482_v53, %v440_v46  ;;  %v1261_v42 = vmov 0.0|0.0   ;;  %vm628_vm10 = vcmask 998400   ;;  %vm916_vm11 = vcmask 392448  }
 0x1a1   :  { %v288_v57 = vpop.permute.xlu0 %287  ;;  %1115 = vmatprep.subr.bf16.mxu0 %v1114_v55  ;;  %v520_v61 = vpop.permute.xlu1 %519 }
 0x1a2   :  { %v291_v59 = vsel %vm277_vm4, %v1525_v10, %v288_v57  ;;  %v292_v60 = vsel %vm277_vm4, %v288_v57, %v290_v29  ;;  %1117 = vmatpush1.bf16.msra.mxu0 %v1116_v56  ;;  %v524_v63 = vsel %vm523_vm12, %v1519_v9, %v520_v61  ;;  %v525_v0 = vsel %vm523_vm12, %v520_v61, %v522_v30  ;;  %v640_v10 = vld [vmem:[#allocation3 + $0x10] sm:$0xff] }
 0x1a3   :  { %300 = vst.msk [vmem:[#allocation3 + $0x20] sm:$0xff] %vm299_vm6, %v292_v60  ;;  %1119 = vmatprep.subr.bf16.mxu0 %v1118_v58  ;;  %v1132_v12 = vpack.c.bf16 %v645_v3, %v640_v10  ;;  %vm689_vm4 = vcmask 588800   ;;  %vm921_vm12 = vcmask 523648  }
 0x1a5   :  { %v331_v62 = vpop.permute.xlu0 %330  ;;  %v562_v6 = vpop.permute.xlu1 %561 }
 0x1a6   :  { %v335_v4 = vsel %vm334_vm13, %v1553_v16, %v331_v62  ;;  %v336_v5 = vsel %vm334_vm13, %v331_v62, %v333_v36  ;;  %1121 = vmatpush1.bf16.msra.mxu0 %v1120_v49  ;;  %v566_v7 = vsel %vm565_vm14, %v1557_v19, %v562_v6  ;;  %v567_v8 = vsel %vm565_vm14, %v562_v6, %v564_v32  ;;  %v677_v62 = vld [vmem:[#allocation3 + $0x138] sm:$0xff] }
 0x1a7   :  { %342 = vst.msk [vmem:[#allocation3 + $0x48] sm:$0xff] %vm299_vm6, %v336_v5  ;;  %1123 = vmatprep.subr.bf16.mxu0 %v1122_v1  ;;  %v1130_v9 = vpack.c.bf16 %v335_v4, %v291_v59  ;;  %v1126_v13 = vpack.c.bf16 %v567_v8, %v525_v0  ;;  %v1128_v25 = vpack.c.bf16 %v566_v7, %v524_v63  ;;  %v672_v4 = vld [vmem:[#allocation3 + $0x110] sm:$0xff]  ;;  %vm926_vm13 = vcmask 654848  }
 0x1a8   :  { %v1156_v6 = vpack.c.bf16 %v677_v62, %v672_v4  ;;  %vm931_vm14 = vcmask 786048  }
 0x1a9   :  { %v373_v14 = vpop.permute.xlu0 %372  ;;  %1131 = vmatprep.subr.bf16.mxu1 %v1130_v9  ;;  %v604_v17 = vpop.permute.xlu1 %603 }
 0x1aa   :  { %v377_v15 = vsel %vm376_vm15, %v1555_v18, %v373_v14  ;;  %v378_v16 = vsel %vm376_vm15, %v373_v14, %v375_v40  ;;  %1125 = vmatpush1.bf16.msra.mxu0 %v1124_v11  ;;  %1133 = vmatpush1.bf16.msra.mxu1 %v1132_v12  ;;  %v608_v19 = vsel %vm607_vm0, %v1563_v22, %v604_v17  ;;  %v642_v38 = vld [vmem:[#allocation3 + $0x20] sm:$0xff]  ;;  %v665_v40 = vld [vmem:[#allocation3 + $0xd8] sm:$0xff]  ;;  %vm936_vm15 = vcmask 917248  }
 0x1ab   :  { %384 = vst.msk [vmem:[#allocation3 + $0x70] sm:$0xff] %vm299_vm6, %v378_v16  ;;  %v609_v24 = vsel %vm607_vm0, %v604_v17, %v1590_v34  ;;  %1127 = vmatprep.subr.bf16.mxu0 %v1126_v13  ;;  %v650_v34 = vld [vmem:[#allocation3 + $0x60] sm:$0xff]  ;;  %vm1011_vm0 = vcmask 703488  }
 0x1ac   :  { %v1136_v37 = vpack.c.bf16 %v655_v27, %v650_v34 }
 0x1ad   :  { %v415_v26 = vpop.permute.xlu0 %414  ;;  %v457_v29 = vpop.permute.xlu1 %456 }
 0x1ae   :  { %v419_v28 = vsel %vm418_vm1, %v1559_v20, %v415_v26  ;;  %v420_v18 = vsel %vm418_vm1, %v415_v26, %v1583_v31  ;;  %1129 = vmatpush1.bf16.msra.mxu0 %v1128_v25  ;;  %v461_v30 = vsel %vm460_vm2, %v1561_v21, %v457_v29  ;;  %v462_v22 = vsel %vm460_vm2, %v457_v29, %v1599_v44  ;;  %v647_v36 = vld [vmem:[#allocation3 + $0x48] sm:$0xff]  ;;  %v1625_v20 = vld [vmem:[%s1790_s1] sm:$0xff] }
 0x1af   :  { %426 = vst.msk [vmem:[#allocation3 + $0x98] sm:$0xff] %vm299_vm6, %v420_v18  ;;  %709 = vmatprep.subr.mxu0 %v609_v24  ;;  %v1134_v32 = vpack.c.bf16 %v419_v28, %v377_v15  ;;  %468 = vst.msk [vmem:[#allocation3 + $0xc0] sm:$0xff] %vm299_vm6, %v462_v22  ;;  %v1147_v39 = vpack.c.bf16 %v647_v36, %v642_v38  ;;  %v660_v44 = vld [vmem:[#allocation3 + $0xb0] sm:$0xff]  ;;  %vm977_vm1 = vcmask 818176   ;;  %vm946_vm2 = vcmask 1048448  }
 0x1b0   :  { %v1140_v46 = vpack.c.bf16 %v665_v40, %v660_v44 }
 0x1b1   :  { %v539_v31 = vpop.permute.xlu0 %538  ;;  %1135 = vmatprep.subr.bf16.mxu1 %v1134_v32  ;;  %v499_v21 = vpop.permute.xlu1 %498 }
 0x1b2   :  { %710 = vmatpush1.msra.mxu0 %v608_v19  ;;  %1137 = vmatpush1.bf16.msra.mxu1 %v1136_v37  ;;  %v503_v41 = vsel %vm502_vm3, %v1565_v23, %v499_v21  ;;  %v652_v23 = vld [vmem:[#allocation3 + $0x70] sm:$0xff] }
 0x1b3   :  { %1146 = vmatprep.subr.bf16.mxu0 %v1261_v42  ;;  %1064 = vmatmul.mubr.msk.f32.vlgmr.msra.gmra.mrb[0].mxu0 %vm689_vm4, %v1625_v20  ;;  %v1138_v43 = vpack.c.bf16 %v503_v41, %v461_v30 }
 0x1b4   :  { %1148 = vmatpush3.bf16.msra.mxu0 %v1147_v39  ;;  %1111 = vmatprep.mubr.msk.f32.mxu0 %vm1262_vm8, %v1229_v2 }
 0x1b5   :  { %v541_v45 = vpop.permute.xlu0 %540  ;;  %1149 = vmatprep.subr.bf16.mxu0 %v1261_v42  ;;  %v501_v50 = vpop.permute.xlu1 %500  ;;  %1139 = vmatprep.subr.bf16.mxu1 %v1138_v43 }
 0x1b6   :  { %v545_v47 = vsel %vm544_vm7, %v539_v31, %v541_v45  ;;  %v546_v48 = vsel %vm544_vm7, %v541_v45, %v1586_v33  ;;  %v657_v51 = vld [vmem:[#allocation3 + $0x98] sm:$0xff]  ;;  %v504_v52 = vsel %vm502_vm3, %v499_v21, %v501_v50  ;;  %1141 = vmatpush1.bf16.msra.mxu1 %v1140_v46  ;;  %v662_v61 = vld [vmem:[#allocation3 + $0xc0] sm:$0xff]  ;;  %vm943_vm3 = vcmask 932864  }
 0x1b7   :  { %550 = vst.msk [vmem:[#allocation3 + $0x100] sm:$0xff] %vm296_vm5, %v545_v47  ;;  %v1150_v53 = vpack.c.bf16 %v657_v51, %v652_v23 }
 0x1b8   :  { %510 = vst.msk [vmem:[#allocation3 + $0xe8] sm:$0xff] %vm299_vm6, %v504_v52 }
 0x1b9   :  { %v583_v54 = vpop.permute.xlu0 %582  ;;  %1151 = vmatpush3.bf16.msra.mxu0 %v1150_v53  ;;  %v581_v56 = vpop.permute.xlu1 %580 }
 0x1ba   :  { %v588_v55 = vsel %vm586_vm9, %v583_v54, %v1594_v35  ;;  %1152 = vmatprep.subr.bf16.mxu0 %v1261_v42  ;;  %v587_v33 = vsel %vm586_vm9, %v581_v56, %v583_v54 }
 0x1bb   :  { %v1142_v57 = vpack.c.bf16 %v588_v55, %v546_v48  ;;  %592 = vst.msk [vmem:[#allocation3 + $0x128] sm:$0xff] %vm296_vm5, %v587_v33 }
 0x1bd   :  { %v625_v58 = vpop.permute.xlu0 %624  ;;  %1143 = vmatprep.subr.bf16.mxu1 %v1142_v57  ;;  %v627_v59 = vpop.permute.xlu1 %626 }
 0x1be   :  { %v630_v60 = vsel %vm628_vm10, %v625_v58, %v627_v59  ;;  %636 = vst.msk [vmem:[#allocation3 + $0x160] sm:$0xff] %vm299_vm6, %v627_v59  ;;  %v670_v35 = vld [vmem:[#allocation3 + $0x100] sm:$0xff]  ;;  %vm911_vm6 = vcmask 261248  }
 0x1bf   :  { %v667_v63 = vld [vmem:[#allocation3 + $0xe8] sm:$0xff] }
 0x1c0   :  { %v1153_v0 = vpack.c.bf16 %v667_v63, %v662_v61 }
 0x1c1   :  { %v623_v49 = vpop.permute.xlu0 %622 }
 0x1c2   :  { %v629_v1 = vsel %vm628_vm10, %v623_v49, %v625_v58  ;;  %1154 = vmatpush3.bf16.msra.mxu0 %v1153_v0  ;;  %v675_v3 = vld [vmem:[#allocation3 + $0x128] sm:$0xff] }
 0x1c3   :  { %634 = vst.msk [vmem:[#allocation3 + $0x150] sm:$0xff] %vm296_vm5, %v629_v1  ;;  %1155 = vmatprep.subr.bf16.mxu0 %v1261_v42  ;;  %v1144_v5 = vpack.c.bf16 %v675_v3, %v670_v35  ;;  %vm905_vm5 = vcmask 130048  }
 0x1c5   :  { %1145 = vmatpush1.bf16.msra.mxu1 %v1144_v5  ;;  %v682_v7 = vld [vmem:[#allocation3 + $0x160] sm:$0xff] }
 0x1c6   :  { %1157 = vmatpush3.bf16.msra.mxu0 %v1156_v6  ;;  %780 = vmatprep.subr.mxu1 %v630_v60 }
 0x1c7   :  { %1109 = vmatprep.subr.mxu0 %v1229_v2 }
 0x1ca   :  { %v680_v8 = vld [vmem:[#allocation3 + $0x150] sm:$0xff]  ;;  %1110 = vmatpush3.msra.mxu0 %v682_v7 }
 0x1cb   :  { %781 = vmatpush1.msra.mxu1 %v680_v8  ;;  %1112 = vmatmul.mubr.msk.f32.vlgmr.msra.gmra.mrb[2].mxu0 %vm689_vm4, %v1625_v20 }
 0x1cc   :  { %1065 = vmatmul.mubr.msk.f32.vlgmr.msra.gmra.mrb[0].mxu1 %vm689_vm4, %v1625_v20 }
 0x1ce   :  { %v687_v9 = vpop.permute.xlu1 %686 }
 0x286   :  { %v759_v10 = vpop.f32.mrb[0].mxu0 }
 0x287   :  { %v760_v11 = vadd.f32 %v759_v10, %v687_v9  ;;  %v761_v12 = vpop.f32.mrb[1].mxu0 }
 0x288   :  { %v762_v17 = vadd.f32 %v761_v12, %v687_v9 }
 0x289   :  { %908 = vrot.lane.b32.xlu0 %v760_v11, %s1245_s10  ;;  %913 = vrot.lane.b32.xlu1 %v760_v11, %s1257_s26  ;;  %906 = vst.msk [vmem:[%s1791_s3] sm:$0xff] %vm905_vm5, %v760_v11  ;;  %s1269_s10 = smov 114  }
 0x28d   :  { %918 = vrot.lane.b32.xlu0 %v760_v11, %s1259_s18 }
 0x29e   :  { %v901_v2 = vpop.f32.mrb[2].mxu0 }
 0x29f   :  { %v830_v13 = vpop.f32.mrb[0].mxu1  ;;  %v1113_v14 = vpop.f32.mrb[3].mxu0  ;;  %v902_v24 = vadd.f32 %v901_v2, %v687_v9 }
 0x2a0   :  { %v831_v15 = vadd.f32 %v830_v13, %v687_v9  ;;  %v832_v16 = vpop.f32.mrb[1].mxu1 }
 0x2a1   :  { %v833_v19 = vadd.f32 %v832_v16, %v687_v9 }
 0x2a2   :  { %990 = vrot.lane.b32.xlu1 %v831_v15, %s1263_s4  ;;  %985 = vrot.lane.b32.xlu0 %v831_v15, %s1225_s17  ;;  %s1271_s17 = smov 98  }
 0x2a6   :  { %998 = vrot.lane.b32.xlu1 %v831_v15, %s1256_s25  ;;  %994 = vrot.lane.b32.xlu0 %v831_v15, %s1249_s16  ;;  %s1273_s16 = smov 106   ;;  %s1283_s25 = smov 66  }
 0x2aa   :  { %923 = vrot.lane.b32.xlu1 %v760_v11, %s1264_s5  ;;  %1007 = vrot.lane.b32.xlu0 %v831_v15, %s1265_s6 }
 0x2ae   :  { %1002 = vrot.lane.b32.xlu1 %v831_v15, %s1266_s7  ;;  %928 = vrot.lane.b32.xlu0 %v760_v11, %s1267_s8 }
 0x2b2   :  { %975 = vrot.lane.b32.xlu1 %v831_v15, %s1268_s9  ;;  %939 = vrot.lane.b32.xlu0 %v760_v11, %s1269_s10 }
 0x2b6   :  { %933 = vrot.lane.b32.xlu1 %v760_v11, %s1270_s11  ;;  %981 = vrot.lane.b32.xlu0 %v831_v15, %s1271_s17 }
 0x2ba   :  { %948 = vrot.lane.b32.xlu1 %v762_v17, %s1223_s15  ;;  %952 = vrot.lane.b32.xlu0 %v762_v17, %s1248_s13  ;;  %s1278_s15 = smov 102   ;;  %s1280_s13 = smov 68  }
 0x2be   :  { %1023 = vrot.lane.b32.xlu1 %v833_v19, %s1222_s14  ;;  %1027 = vrot.lane.b32.xlu0 %v833_v19, %s1272_s12  ;;  %s1279_s14 = smov 84  }
 0x2c2   :  { %956 = vrot.lane.b32.xlu1 %v762_v17, %s1250_s19  ;;  %960 = vrot.lane.b32.xlu0 %v762_v17, %s1273_s16  ;;  %s1281_s19 = smov 70  }
 0x2c6   :  { %1031 = vrot.lane.b32.xlu1 %v833_v19, %s1274_s20  ;;  %1035 = vrot.lane.b32.xlu0 %v833_v19, %s1275_s21 }
 0x2ca   :  { %1040 = vrot.lane.b32.xlu1 %v833_v19, %s1276_s22  ;;  %964 = vrot.lane.b32.xlu0 %v762_v17, %s1277_s0 }
 0x2ce   :  { %1009 = vrot.lane.b32.xlu1 %v833_v19, %s1265_s6  ;;  %973 = vrot.lane.b32.xlu0 %v762_v17, %s1268_s9 }
 0x2d2   :  { %968 = vrot.lane.b32.xlu1 %v762_v17, %s1278_s15  ;;  %1015 = vrot.lane.b32.xlu0 %v833_v19, %s1279_s14 }
 0x2d6   :  { %941 = vrot.lane.b32.xlu1 %v762_v17, %s1269_s10  ;;  %1042 = vrot.lane.b32.xlu0 %v902_v24, %s1276_s22 }
 0x2da   :  { %1051 = vrot.lane.b32.xlu1 %v902_v24, %s1280_s13  ;;  %1047 = vrot.lane.b32.xlu0 %v902_v24, %s1281_s19 }
 0x2de   :  { %1019 = vrot.lane.b32.xlu1 %v833_v19, %s1282_s24  ;;  %1055 = vrot.lane.b32.xlu0 %v902_v24, %s1283_s25 }
 0x2fb   :  { %v909_v25 = vpop.permute.xlu0 %908  ;;  %v914_v26 = vpop.permute.xlu1 %913 }
 0x2fc   :  { %912 = vst.msk [vmem:[%s1791_s3] sm:$0xff] %vm911_vm6, %v909_v25 }
 0x2fd   :  { %917 = vst.msk [vmem:[%s1791_s3] sm:$0xff] %vm916_vm11, %v914_v26 }
 0x2ff   :  { %v919_v27 = vpop.permute.xlu0 %918 }
 0x300   :  { %922 = vst.msk [vmem:[%s1791_s3] sm:$0xff] %vm921_vm12, %v919_v27 }
 0x314   :  { %v991_v28 = vpop.permute.xlu1 %990  ;;  %v986_v18 = vpop.permute.xlu0 %985 }
 0x315   :  { %1067 = vst.msk [vmem:[%s1791_s3 + $0x10] sm:$0xff] %vm905_vm5, %v986_v18 }
 0x316   :  { %1068 = vst.msk [vmem:[%s1791_s3 + $0x10] sm:$0xff] %vm911_vm6, %v991_v28 }
 0x318   :  { %v999_v29 = vpop.permute.xlu1 %998  ;;  %v995_v30 = vpop.permute.xlu0 %994 }
 0x319   :  { %1069 = vst.msk [vmem:[%s1791_s3 + $0x10] sm:$0xff] %vm916_vm11, %v995_v30 }
 0x31a   :  { %1070 = vst.msk [vmem:[%s1791_s3 + $0x10] sm:$0xff] %vm921_vm12, %v999_v29 }
 0x31c   :  { %v924_v22 = vpop.permute.xlu1 %923  ;;  %v1008_v32 = vpop.permute.xlu0 %1007 }
 0x31d   :  { %927 = vst.msk [vmem:[%s1791_s3] sm:$0xff] %vm926_vm13, %v924_v22 }
 0x320   :  { %v1003_v34 = vpop.permute.xlu1 %1002  ;;  %v929_v36 = vpop.permute.xlu0 %928 }
 0x321   :  { %1071 = vst.msk [vmem:[%s1791_s3 + $0x10] sm:$0xff] %vm926_vm13, %v1003_v34 }
 0x322   :  { %932 = vst.msk [vmem:[%s1791_s3] sm:$0xff] %vm931_vm14, %v929_v36 }
 0x324   :  { %v976_v37 = vpop.permute.xlu1 %975  ;;  %v940_v20 = vpop.permute.xlu0 %939 }
 0x328   :  { %v934_v31 = vpop.permute.xlu1 %933  ;;  %v982_v38 = vpop.permute.xlu0 %981 }
 0x329   :  { %937 = vst.msk [vmem:[%s1791_s3] sm:$0xff] %vm936_vm15, %v934_v31 }
 0x32c   :  { %v949_v21 = vpop.permute.xlu1 %948  ;;  %v953_v39 = vpop.permute.xlu0 %952 }
 0x32d   :  { %951 = vst.msk [vmem:[%s1791_s3 + $0x8] sm:$0xff] %vm905_vm5, %v949_v21 }
 0x32e   :  { %955 = vst.msk [vmem:[%s1791_s3 + $0x8] sm:$0xff] %vm911_vm6, %v953_v39 }
 0x330   :  { %v1024_v40 = vpop.permute.xlu1 %1023  ;;  %v1028_v41 = vpop.permute.xlu0 %1027 }
 0x331   :  { %1075 = vst.msk [vmem:[%s1791_s3 + $0x18] sm:$0xff] %vm905_vm5, %v1024_v40 }
 0x332   :  { %1076 = vst.msk [vmem:[%s1791_s3 + $0x18] sm:$0xff] %vm911_vm6, %v1028_v41 }
 0x334   :  { %v957_v42 = vpop.permute.xlu1 %956  ;;  %v961_v43 = vpop.permute.xlu0 %960 }
 0x335   :  { %959 = vst.msk [vmem:[%s1791_s3 + $0x8] sm:$0xff] %vm916_vm11, %v957_v42 }
 0x336   :  { %963 = vst.msk [vmem:[%s1791_s3 + $0x8] sm:$0xff] %vm921_vm12, %v961_v43 }
 0x338   :  { %v1032_v44 = vpop.permute.xlu1 %1031  ;;  %v1036_v45 = vpop.permute.xlu0 %1035 }
 0x339   :  { %1077 = vst.msk [vmem:[%s1791_s3 + $0x18] sm:$0xff] %vm916_vm11, %v1032_v44 }
 0x33a   :  { %1078 = vst.msk [vmem:[%s1791_s3 + $0x18] sm:$0xff] %vm921_vm12, %v1036_v45 }
 0x33c   :  { %v1041_v46 = vpop.permute.xlu1 %1040  ;;  %v965_v47 = vpop.permute.xlu0 %964 }
 0x33d   :  { %967 = vst.msk [vmem:[%s1791_s3 + $0x8] sm:$0xff] %vm926_vm13, %v965_v47 }
 0x340   :  { %v1010_v48 = vpop.permute.xlu1 %1009  ;;  %v974_v50 = vpop.permute.xlu0 %973 }
 0x341   :  { %v1012_v23 = vsel %vm1011_vm0, %v1008_v32, %v1010_v48  ;;  %v978_v53 = vsel %vm977_vm1, %v974_v50, %v976_v37 }
 0x342   :  { %1072 = vst.msk [vmem:[%s1791_s3 + $0x10] sm:$0xff] %vm931_vm14, %v1012_v23 }
 0x344   :  { %v969_v51 = vpop.permute.xlu1 %968  ;;  %v1016_v52 = vpop.permute.xlu0 %1015 }
 0x345   :  { %971 = vst.msk [vmem:[%s1791_s3 + $0x8] sm:$0xff] %vm931_vm14, %v969_v51 }
 0x346   :  { %1073 = vst.msk [vmem:[%s1791_s3 + $0x10] sm:$0xff] %vm936_vm15, %v1016_v52  ;;  %980 = vst.msk [vmem:[%s1791_s3 + $0x8] sm:$0xff] %vm936_vm15, %v978_v53 }
 0x347   :  { %984 = vst.msk [vmem:[%s1791_s3 + $0x8] sm:$0xff] %vm946_vm2, %v982_v38 }
 0x348   :  { %v942_v54 = vpop.permute.xlu1 %941  ;;  %v1043_v55 = vpop.permute.xlu0 %1042 }
 0x349   :  { %v944_v56 = vsel %vm943_vm3, %v940_v20, %v942_v54  ;;  %v1044_v33 = vsel %vm689_vm4, %v1041_v46, %v1043_v55 }
 0x34a   :  { %947 = vst.msk [vmem:[%s1791_s3] sm:$0xff] %vm946_vm2, %v944_v56 }
 0x34b   :  { %1079 = vst.msk [vmem:[%s1791_s3 + $0x18] sm:$0xff] %vm926_vm13, %v1044_v33 }
 0x34c   :  { %v1052_v57 = vpop.permute.xlu1 %1051  ;;  %v1048_v58 = vpop.permute.xlu0 %1047 }
 0x34d   :  { %1080 = vst.msk [vmem:[%s1791_s3 + $0x18] sm:$0xff] %vm931_vm14, %v1048_v58 }
 0x34e   :  { %1081 = vst.msk [vmem:[%s1791_s3 + $0x18] sm:$0xff] %vm936_vm15, %v1052_v57 }
 0x350   :  { %v1020_v59 = vpop.permute.xlu1 %1019  ;;  %v1056_v60 = vpop.permute.xlu0 %1055 }
 0x351   :  { %1074 = vst.msk [vmem:[%s1791_s3 + $0x10] sm:$0xff] %vm946_vm2, %v1020_v59  ;;  %1082 = vst.msk [vmem:[%s1791_s3 + $0x18] sm:$0xff] %vm946_vm2, %v1056_v60 }

</bundles_post_ra>
